<compile_context>
chip_gen: v5e
topology: v5e:2x2
jax: 0.10.0
libtpu: 0.0.40
codegen_flags: <defaults>
</compile_context>

<pallas_src>
import numpy as np
import jax
import jax.numpy as jnp
from jax import lax
from jax.experimental import pallas as pl
from jax.experimental.pallas import tpu as pltpu

# ----------------------------------------------------------------------------
# Clifford algebra Cl(3,0,0) tables (static, numpy)
# ----------------------------------------------------------------------------
BLADES = [(), (1,), (2,), (3,), (1, 2), (1, 3), (2, 3), (1, 2, 3)]
N_BLADES = 8
BLADE_GRADES = np.array([len(b) for b in BLADES])        # [0,1,1,1,2,2,2,3]


def _blade_mul(a, b):
    lst = list(a) + list(b)
    sign = 1
    for i in range(len(lst)):                            # bubble sort, count swaps
        for j in range(len(lst) - 1 - i):
            if lst[j] > lst[j + 1]:
                lst[j], lst[j + 1] = lst[j + 1], lst[j]
                sign = -sign
    out, k = [], 0
    while k < len(lst):
        if k + 1 < len(lst) and lst[k] == lst[k + 1]:
            k += 2                                       # e_i e_i = +1  (metric (1,1,1))
        else:
            out.append(lst[k]); k += 1
    return sign, tuple(out)


def make_cayley():
    c = np.zeros((8, 8, 8), dtype=np.float32)
    for i, bi in enumerate(BLADES):
        for j, bj in enumerate(BLADES):
            sign, blade = _blade_mul(bi, bj)
            c[i, j, BLADES.index(blade)] = sign
    return c


CAYLEY = make_cayley()

# ----------------------------------------------------------------------------
# configuration (small synthetic sizes consistent with the module)
# ----------------------------------------------------------------------------
N_NODES = 8
NS = 32          # node_features_s  (== hidden so `s + output` broadcasts)
HS = 32          # hidden_features_s
NV = 8           # node_features_v
EF = NV          # edge_features
MV = NV * N_BLADES                                       # 64: flat multivector width
OUT_W = 128                                              # lane-dense fused output width
EPS_LN = 1e-6

# node-slab lane layout: [ v (0:64) | s (64:96) | rsqrt(bincount(send)) (96) | pad ]
V_OFF, S_OFF, C_OFF = 0, MV, MV + NS

# ----------------------------------------------------------------------------
# static helper matrices for the flat (channel-major, blade-minor) mv layout
# ----------------------------------------------------------------------------
GSUM = np.zeros((MV, NV), np.float32)                    # sum over blades per channel
for c in range(NV):
    GSUM[c * 8:(c + 1) * 8, c] = 1.0


def gp_wide_matrices(nv):
    """Collapsed geometric product (per channel, Cl(3)):
         lw = vl @ GPLW : lw[:, j*MV + c*8 + k] = sum_i vl[:, c*8+i] * CAYLEY[i, j, k]
         rw = vr @ SELW : rw[:, j*MV + c*8 + k] = vr[:, c*8+j]
         gp[:, c*8+k]   = sum_j (lw * rw)[:, j*MV + c*8 + k]
    """
    gplw = np.zeros((nv * 8, 8, nv * 8), np.float32)
    selw = np.zeros((nv * 8, 8, nv * 8), np.float32)
    for j in range(8):
        for c in range(nv):
            gplw[c * 8:(c + 1) * 8, j, c * 8:(c + 1) * 8] = CAYLEY[:, j, :]
            selw[c * 8 + j, j, c * 8:(c + 1) * 8] = 1.0
    return gplw.reshape(nv * 8, 8 * nv * 8), selw.reshape(nv * 8, 8 * nv * 8)


GPLW, SELW = gp_wide_matrices(NV)                        # (64, 512), entries in {0,+-1}
WGP = np.zeros((2 * MV, 2 * 8 * MV), np.float32)         # block-diag([GPLW, SELW]) (128, 1024)
WGP[:MV, :8 * MV] = GPLW
WGP[MV:, 8 * MV:] = SELW


def mv_linear_dense(weight, bias):
    """MVLinear(subspaces=True, bias=True) as a dense (in*8, out*8) matrix + bias."""
    out_ch, in_ch, _ = weight.shape
    w_full = weight[..., BLADE_GRADES]                   # repeat_interleave([1,3,3,1])
    eye = np.eye(8, dtype=np.float32)
    big = np.einsum('nmi,ik->mink', w_full, eye).reshape(in_ch * 8, out_ch * 8)
    b_big = np.zeros((out_ch, 8), np.float32)
    b_big[:, 0] = bias                                   # bias only on grade-0 blade
    return big.astype(np.float32), b_big.reshape(-1)


# ----------------------------------------------------------------------------
# fused Pallas kernel (single invocation, everything VMEM-resident)
# ----------------------------------------------------------------------------
def egnn_fused_kernel(node_ref, oh_ref, scat_ref,
                      wv_ref, wm1_ref, wm2_ref, wp1_ref, wp2g_ref,
                      wu1_ref, wu2_ref, wlr_ref, wgp_ref, wvoa_ref, wob_ref,
                      gsum_ref, bias_ref, out_ref):
    f32, bf16 = jnp.float32, jnp.bfloat16

    def mm(a, w_ref):     # bf16 MXU operands, f32 accumulation
        return jnp.dot(a.astype(bf16), w_ref[...], preferred_element_type=f32)

    # --------------------------- unpack the bias slab (one vreg, one DMA) ----
    bias = bias_ref[...]                                            # (8,128) f32
    bv, bp2g, bo = bias[0:1, :MV], bias[2:3, :MV], bias[2:3, MV:2 * MV]
    bm1, bm2 = bias[1:2, :HS], bias[1:2, HS:2 * HS]
    bp1, bu1 = bias[1:2, 2 * HS:3 * HS], bias[1:2, 3 * HS:4 * HS]
    bu2, a_exp = bias[3:4, :HS], bias[3:4, MV:2 * MV]
    b_lr = bias[4:5, :]                                             # [bl | br] (1,128)

    node = node_ref[...]                                            # (N,128) f32
    node_b = node.astype(bf16)
    v_in = node[:, V_OFF:V_OFF + MV]
    s_in = node[:, S_OFF:S_OFF + NS]
    isc = node[:, C_OFF:C_OFF + 1]         # rsqrt(bincount(send)); 0 on padded rows

    # ----------------- edge gathers as one-hot MXU matmuls (huge MXU slack) --
    gs = jnp.dot(oh_ref[0], node_b, preferred_element_type=f32)     # send rows (E,128)
    gr = jnp.dot(oh_ref[1], node_b, preferred_element_type=f32)     # rec  rows (E,128)
    dv = gr[:, V_OFF:V_OFF + MV] - gs[:, V_OFF:V_OFF + MV]          # v_j - v_i
    s_i = gs[:, S_OFF:S_OFF + NS]
    s_j = gr[:, S_OFF:S_OFF + NS]

    # ------------------------------- edge phase ------------------------------
    v_ij = mm(dv, wv_ref) + bv                                      # (E,64)  self.v MVLinear
    vq = v_ij * v_ij
    # message_net layer 1: single K=128 matmul on [s_i | s_j | vq] (GSUM folded into wm1 rows 64:128)
    x = jnp.concatenate([s_i, s_j, vq], axis=-1)                    # (E,128)
    h1 = jnp.maximum(mm(x, wm1_ref) + bm1, 0.0)
    msg = mm(h1, wm2_ref) + bm2                                     # (E,HS)
    # pos_net (Wp2 pre-folded with the per-channel blade broadcast)
    h2 = jnp.maximum(mm(msg, wp1_ref) + bp1, 0.0)
    pos = v_ij * (mm(h2, wp2g_ref) + bp2g)                          # (E,64)

    # ------------- aggregation: scatter-add over receivers as one-hot matmul -
    scat = scat_ref[...]                                            # (N,E) bf16 {0,1}
    msg_aggr = jnp.dot(scat, msg.astype(bf16), preferred_element_type=f32) * isc
    pos_aggr = jnp.dot(scat, pos.astype(bf16), preferred_element_type=f32) * isc

    # ---------------------------- node update (scalars) ----------------------
    hu = jnp.maximum(mm(jnp.concatenate([s_in, msg_aggr], axis=-1), wu1_ref) + bu1, 0.0)
    s_new = s_in + mm(hu, wu2_ref) + bu2                            # (N,HS) residual

    # --------------- vector update: LinearFullyConnectedGPLayer(pos_aggr) ----
    vlr = mm(pos_aggr, wlr_ref) + b_lr                              # [vl | vr]  (N,128)
    lwrw = mm(vlr, wgp_ref)                                         # [lw | rw]  (N,1024)
    lr = lwrw[:, :8 * MV] * lwrw[:, 8 * MV:]                        # (N,512)
    # blade fold done on the MXU: Wvoa = tile(Wo_a,(8,1))  =>  lr @ Wvoa == gp @ Wo_a
    vo = mm(lr, wvoa_ref) + mm(pos_aggr, wob_ref) + bo              # linear_out([gp, pos_aggr])
    # MVLayerNorm
    q = mm(vo * vo, gsum_ref)                                       # (N,NV)
    nrm = jnp.sqrt(jnp.sqrt(q * q + 1e-16))                         # smooth |q|^0.5
    nmean = jnp.mean(nrm, axis=-1, keepdims=True) + EPS_LN
    v_new = a_exp * vo * pl.reciprocal(nmean, approx=True) + v_in   # (N,64) residual

    # single lane-dense 128-wide output slab, one unmasked store
    pad = jnp.zeros((s_new.shape[0], OUT_W - HS - MV), f32)
    out_ref[...] = jnp.concatenate([s_new, v_new, pad], axis=-1)


# ----------------------------------------------------------------------------
# wrapper
# ----------------------------------------------------------------------------
def egnn_c_block_forward(s, v, edge_index, kp):
    send, rec = edge_index
    N, E = s.shape[0], send.shape[0]
    E_pad = ((E + 15) // 16) * 16                                   # bf16 sublane tile
    N_pad = ((N + 15) // 16) * 16
    npd = N_pad - N

    # node slab: [v | s | rsqrt(bincount(send)) | 0]; padded rows are all-zero (isc=0 -> no inf)
    counts = jnp.zeros((N,), jnp.float32).at[send].add(1.0)
    isc = lax.rsqrt(counts)        # inf if a real node has no outgoing edges (matches module 0/0)
    node = jnp.concatenate(
        [v.reshape(N, MV), s, isc[:, None],
         jnp.zeros((N, OUT_W - MV - NS - 1), jnp.float32)], axis=-1)
    node = jnp.pad(node, ((0, npd), (0, 0)))

    # one-hot gather (send/rec) and scatter (rec) matrices; padded edges = zero rows/cols
    ar = jnp.arange(N_pad, dtype=jnp.int32)
    oh = jnp.stack([send[:, None] == ar[None, :],
                    rec[:, None] == ar[None, :]], axis=0)
    oh = jnp.pad(oh, ((0, 0), (0, E_pad - E), (0, 0))).astype(jnp.bfloat16)      # (2,E_pad,N_pad)
    scat = jnp.pad(rec[None, :] == ar[:, None],
                   ((0, 0), (0, E_pad - E))).astype(jnp.bfloat16)                # (N_pad,E_pad)
    # TODO(synk): for large graphs replace the dense one-hots with scalar-prefetched send/rec
    # (PrefetchScalarGridSpec) + edge-tiled in-kernel accumulation sized for v7x's 64 MiB VMEM,
    # and batch graphs along a leading 'parallel' grid axis to fill the MXU / both v7x TensorCores.

    weights = [kp[k] for k in ('Wv', 'Wm1', 'Wm2', 'Wp1', 'Wp2g', 'Wu1', 'Wu2',
                               'Wlr', 'Wgp', 'Wvoa', 'Wob', 'GSUM', 'bias')]
    operands = [node, oh, scat] + weights

    bytes_accessed = sum(int(np.prod(a.shape)) * a.dtype.itemsize for a in operands) \
        + N_pad * OUT_W * 4
    flops = 2 * (2 * E_pad * N_pad * OUT_W                          # gathers
                 + E_pad * (MV * MV + 128 * HS + 2 * HS * HS + HS * MV)   # edge matmuls
                 + N_pad * E_pad * (HS + MV)                        # scatters
                 + N_pad * (2 * HS * HS + HS * HS + MV * 128 + 128 * 1024
                            + 8 * MV * MV + MV * MV + MV * NV))     # node matmuls

    out = pl.pallas_call(
        egnn_fused_kernel,
        out_shape=jax.ShapeDtypeStruct((N_pad, OUT_W), jnp.float32),
        cost_estimate=pl.CostEstimate(flops=int(flops),
                                      transcendentals=int(N_pad * 24),
                                      bytes_accessed=int(bytes_accessed)),
        compiler_params=pltpu.CompilerParams(),
    )(*operands)

    s_out = out[:N, :HS]
    v_out = out[:N, HS:HS + MV].reshape(N, NV, N_BLADES)
    return s_out, v_out


# ----------------------------------------------------------------------------
# deterministic parameter init (synthetic; no checkpoint loading)
# ----------------------------------------------------------------------------
def init_params():
    rng = np.random.RandomState(0)
    lin = lambda i, o: (rng.normal(0, 0.1, (i, o)).astype(np.float32),
                        rng.normal(0, 0.1, (o,)).astype(np.float32))
    mvl = lambda i, o: (rng.normal(0, 0.2, (o, i, 4)).astype(np.float32),
                        rng.normal(0, 0.1, (o,)).astype(np.float32))
    p = {}
    p['Wm1'], p['bm1'] = lin(2 * NS + EF, HS)          # message_net
    p['Wm2'], p['bm2'] = lin(HS, HS)
    p['Wu1'], p['bu1'] = lin(NS + HS, HS)              # update_net
    p['Wu2'], p['bu2'] = lin(HS, HS)
    p['Wp1'], p['bp1'] = lin(HS, HS)                   # pos_net
    p['Wp2'], p['bp2'] = lin(HS, NV)                   # factor = 1 (subspaces=False)
    p['v_w'], p['v_b'] = mvl(NV, NV)                   # self.v
    p['l_w'], p['l_b'] = mvl(NV, NV)                   # v_update.linear_left
    p['r_w'], p['r_b'] = mvl(NV, NV)                   # v_update.linear_right
    p['o_w'], p['o_b'] = mvl(2 * NV, NV)               # v_update.linear_out
    p['ln_a'] = np.ones((NV,), np.float32)             # MVLayerNorm scale
    return p


def kernel_params(p):
    wv, bv = mv_linear_dense(p['v_w'], p['v_b'])
    wl, bl = mv_linear_dense(p['l_w'], p['l_b'])
    wr, br = mv_linear_dense(p['r_w'], p['r_b'])
    wo, bo = mv_linear_dense(p['o_w'], p['o_b'])

    kp = {
        'Wv': wv,
        # rows 0:64 = [s_i|s_j] weight, rows 64:128 = blade-sum(GSUM)-folded edge_attr weight
        'Wm1': np.concatenate([p['Wm1'][:2 * NS], GSUM @ p['Wm1'][2 * NS:]], axis=0),
        'Wm2': p['Wm2'], 'Wp1': p['Wp1'],
        # Wp2 folded with the per-channel blade broadcast (each column repeated over 8 blades)
        'Wp2g': np.repeat(p['Wp2'], N_BLADES, axis=1),
        'Wu1': p['Wu1'],                                # already stacked for [s | msg_aggr]
        'Wu2': p['Wu2'],
        'Wlr': np.concatenate([wl, wr], axis=1),        # (64,128): [Wl | Wr]
        'Wgp': WGP,                                     # (128,1024) block-diag(GPLW, SELW)
        'Wvoa': np.tile(wo[:MV], (8, 1)),               # (512,64): blade-fold pre-applied to Wo_a
        'Wob': wo[MV:],
        'GSUM': GSUM,
    }
    # single (8,128) f32 bias/scale slab == one vreg, one DMA
    bias = np.zeros((8, OUT_W), np.float32)
    bias[0, :MV] = bv
    bias[1, :HS] = p['bm1']; bias[1, HS:2 * HS] = p['bm2']
    bias[1, 2 * HS:3 * HS] = p['bp1']; bias[1, 3 * HS:4 * HS] = p['bu1']
    bias[2, :MV] = np.repeat(p['bp2'], N_BLADES); bias[2, MV:2 * MV] = bo
    bias[3, :HS] = p['bu2']; bias[3, MV:2 * MV] = np.repeat(p['ln_a'], N_BLADES)
    bias[4, :] = np.concatenate([bl, br])
    kp['bias'] = bias

    # matmul operand matrices -> bf16 (exact for the 0/+-1 tables); bias slab stays f32
    return {k: jnp.asarray(v, jnp.float32 if k == 'bias' else jnp.bfloat16)
            for k, v in kp.items()}


# ----------------------------------------------------------------------------
# pure-JAX f32 reference (mirrors the PyTorch forward, used for validation)
# ----------------------------------------------------------------------------
def mv_linear_ref(x, w, b):
    y = jnp.einsum('bmi,nmi->bni', x, jnp.asarray(w[..., BLADE_GRADES]))
    return y.at[..., 0].add(jnp.asarray(b))


def mv_layernorm_ref(x, a):
    q = jnp.sum(x * x, axis=-1, keepdims=True)
    nrm = jnp.sqrt(jnp.sqrt(q * q + 1e-16))
    nmean = jnp.mean(nrm, axis=1, keepdims=True) + EPS_LN
    return jnp.asarray(a)[None, :, None] * x / nmean


def ref_forward(s, v, edge_index, p):
    send, rec = edge_index
    N = s.shape[0]
    cay = jnp.asarray(CAYLEY)
    s_i, s_j = s[send], s[rec]
    v_i, v_j = v[send], v[rec]
    v_ij = mv_linear_ref(v_j - v_i, p['v_w'], p['v_b'])
    edge_attr = jnp.sum(v_ij * v_ij, axis=-1)
    x = jnp.concatenate([s_i, s_j, edge_attr], axis=-1)
    msg = jax.nn.relu(x @ p['Wm1'] + p['bm1']) @ p['Wm2'] + p['bm2']
    pw = jax.nn.relu(msg @ p['Wp1'] + p['bp1']) @ p['Wp2'] + p['bp2']
    pos = v_ij * pw[..., None]
    counts = jnp.zeros((N,), jnp.float32).at[send].add(1.0)
    msg_aggr = jnp.zeros((N, HS)).at[rec].add(msg) / jnp.sqrt(counts)[:, None]
    pos_aggr = jnp.zeros((N, NV, 8)).at[rec].add(pos) / jnp.sqrt(counts)[:, None, None]
    out = jax.nn.relu(jnp.concatenate([s, msg_aggr], -1) @ p['Wu1'] + p['bu1']) @ p['Wu2'] + p['bu2']
    s_out = s + out
    vl = mv_linear_ref(pos_aggr, p['l_w'], p['l_b'])
    vr = mv_linear_ref(pos_aggr, p['r_w'], p['r_b'])
    gp = jnp.einsum('bci,ijk,bcj->bck', vl, cay, vr)
    vo = mv_linear_ref(jnp.concatenate([gp, pos_aggr], axis=1), p['o_w'], p['o_b'])
    v_out = mv_layernorm_ref(vo, p['ln_a']) + v
    return s_out, v_out


# ----------------------------------------------------------------------------
if __name__ == "__main__":
    key = jax.random.PRNGKey(0)
    k1, k2 = jax.random.split(key)
    s = jax.random.normal(k1, (N_NODES, NS), jnp.float32)
    v = jax.random.normal(k2, (N_NODES, NV, N_BLADES), jnp.float32)
    # fully-connected directed graph without self loops (E = 56)
    snd, rcv = np.nonzero(~np.eye(N_NODES, dtype=bool))
    send = jnp.asarray(snd, jnp.int32)
    rec = jnp.asarray(rcv, jnp.int32)

    p = init_params()
    kp = kernel_params(p)

    fwd = jax.jit(egnn_c_block_forward)
    s_out, v_out = fwd(s, v, (send, rec), kp)
    jax.block_until_ready((s_out, v_out))

    s_ref, v_ref = ref_forward(s, v, (send, rec), p)
    err_s = float(jnp.max(jnp.abs(s_out - s_ref)))
    err_v = float(jnp.max(jnp.abs(v_out - v_ref)))
    # bf16 MXU operands (per perf review) vs. an f32 reference -> loosened tolerance
    assert err_s < 1e-1 and err_v < 1e-1, (err_s, err_v)
    print("KERNEL_OK")
</pallas_src>

<mosaic_0001>
module attributes {stable_mosaic.version = 11 : i64} {
  func.func @egnn_fused_kernel(%arg0: memref<16x128xf32, #tpu.memory_space<vmem>>, %arg1: memref<2x64x16xbf16, #tpu.memory_space<vmem>>, %arg2: memref<16x64xbf16, #tpu.memory_space<vmem>>, %arg3: memref<64x64xbf16, #tpu.memory_space<vmem>>, %arg4: memref<128x32xbf16, #tpu.memory_space<vmem>>, %arg5: memref<32x32xbf16, #tpu.memory_space<vmem>>, %arg6: memref<32x32xbf16, #tpu.memory_space<vmem>>, %arg7: memref<32x64xbf16, #tpu.memory_space<vmem>>, %arg8: memref<64x32xbf16, #tpu.memory_space<vmem>>, %arg9: memref<32x32xbf16, #tpu.memory_space<vmem>>, %arg10: memref<64x128xbf16, #tpu.memory_space<vmem>>, %arg11: memref<128x1024xbf16, #tpu.memory_space<vmem>>, %arg12: memref<512x64xbf16, #tpu.memory_space<vmem>>, %arg13: memref<64x64xbf16, #tpu.memory_space<vmem>>, %arg14: memref<64x8xbf16, #tpu.memory_space<vmem>>, %arg15: memref<8x128xf32, #tpu.memory_space<vmem>>, %arg16: memref<16x128xf32, #tpu.memory_space<vmem>>) attributes {dimension_semantics = [], scalar_prefetch = 0 : i64, scratch_operands = 0 : i64, tpu.core_type = #tpu.core_type<tc>} {
    %c0 = arith.constant 0 : index
    %c0_0 = arith.constant 0 : index
    %0 = vector.load %arg15[%c0, %c0_0] : memref<8x128xf32, #tpu.memory_space<vmem>>, vector<8x128xf32>
    %1 = vector.extract_strided_slice %0 {offsets = [0, 0], sizes = [1, 64], strides = [1, 1]} : vector<8x128xf32> to vector<1x64xf32>
    %2 = vector.extract_strided_slice %0 {offsets = [2, 0], sizes = [1, 64], strides = [1, 1]} : vector<8x128xf32> to vector<1x64xf32>
    %3 = vector.extract_strided_slice %0 {offsets = [2, 64], sizes = [1, 64], strides = [1, 1]} : vector<8x128xf32> to vector<1x64xf32>
    %4 = vector.extract_strided_slice %0 {offsets = [1, 0], sizes = [1, 32], strides = [1, 1]} : vector<8x128xf32> to vector<1x32xf32>
    %5 = vector.extract_strided_slice %0 {offsets = [1, 32], sizes = [1, 32], strides = [1, 1]} : vector<8x128xf32> to vector<1x32xf32>
    %6 = vector.extract_strided_slice %0 {offsets = [1, 64], sizes = [1, 32], strides = [1, 1]} : vector<8x128xf32> to vector<1x32xf32>
    %7 = vector.extract_strided_slice %0 {offsets = [1, 96], sizes = [1, 32], strides = [1, 1]} : vector<8x128xf32> to vector<1x32xf32>
    %8 = vector.extract_strided_slice %0 {offsets = [3, 0], sizes = [1, 32], strides = [1, 1]} : vector<8x128xf32> to vector<1x32xf32>
    %9 = vector.extract_strided_slice %0 {offsets = [3, 64], sizes = [1, 64], strides = [1, 1]} : vector<8x128xf32> to vector<1x64xf32>
    %10 = vector.extract_strided_slice %0 {offsets = [4, 0], sizes = [1, 128], strides = [1, 1]} : vector<8x128xf32> to vector<1x128xf32>
    %c0_1 = arith.constant 0 : index
    %c0_2 = arith.constant 0 : index
    %11 = vector.load %arg0[%c0_1, %c0_2] : memref<16x128xf32, #tpu.memory_space<vmem>>, vector<16x128xf32>
    %12 = arith.truncf %11 : vector<16x128xf32> to vector<16x128xbf16>
    %13 = vector.extract_strided_slice %11 {offsets = [0, 0], sizes = [16, 64], strides = [1, 1]} : vector<16x128xf32> to vector<16x64xf32>
    %14 = vector.extract_strided_slice %11 {offsets = [0, 64], sizes = [16, 32], strides = [1, 1]} : vector<16x128xf32> to vector<16x32xf32>
    %15 = vector.extract_strided_slice %11 {offsets = [0, 96], sizes = [16, 1], strides = [1, 1]} : vector<16x128xf32> to vector<16x1xf32>
    %c0_3 = arith.constant 0 : index
    %c0_4 = arith.constant 0 : index
    %c0_5 = arith.constant 0 : index
    %16 = vector.load %arg1[%c0_3, %c0_4, %c0_5] : memref<2x64x16xbf16, #tpu.memory_space<vmem>>, vector<1x64x16xbf16>
    %17 = vector.shape_cast %16 : vector<1x64x16xbf16> to vector<64x16xbf16>
    %cst = arith.constant dense<0.000000e+00> : vector<64x128xf32>
    %18 = tpu.matmul %17, %12, %cst {dimension_numbers = #tpu.dot_dimension_numbers<[1], [0], [0], [1], [0, 0, 1, 1], [], []>} : vector<64x16xbf16>, vector<16x128xbf16>, vector<64x128xf32> -> vector<64x128xf32>
    %c1 = arith.constant 1 : index
    %c0_6 = arith.constant 0 : index
    %c0_7 = arith.constant 0 : index
    %19 = vector.load %arg1[%c1, %c0_6, %c0_7] : memref<2x64x16xbf16, #tpu.memory_space<vmem>>, vector<1x64x16xbf16>
    %20 = vector.shape_cast %19 : vector<1x64x16xbf16> to vector<64x16xbf16>
    %cst_8 = arith.constant dense<0.000000e+00> : vector<64x128xf32>
    %21 = tpu.matmul %20, %12, %cst_8 {dimension_numbers = #tpu.dot_dimension_numbers<[1], [0], [0], [1], [0, 0, 1, 1], [], []>} : vector<64x16xbf16>, vector<16x128xbf16>, vector<64x128xf32> -> vector<64x128xf32>
    %22 = vector.extract_strided_slice %21 {offsets = [0, 0], sizes = [64, 64], strides = [1, 1]} : vector<64x128xf32> to vector<64x64xf32>
    %23 = vector.extract_strided_slice %18 {offsets = [0, 0], sizes = [64, 64], strides = [1, 1]} : vector<64x128xf32> to vector<64x64xf32>
    %24 = arith.subf %22, %23 : vector<64x64xf32>
    %25 = vector.extract_strided_slice %18 {offsets = [0, 64], sizes = [64, 32], strides = [1, 1]} : vector<64x128xf32> to vector<64x32xf32>
    %26 = vector.extract_strided_slice %21 {offsets = [0, 64], sizes = [64, 32], strides = [1, 1]} : vector<64x128xf32> to vector<64x32xf32>
    %27 = arith.truncf %24 : vector<64x64xf32> to vector<64x64xbf16>
    %c0_9 = arith.constant 0 : index
    %c0_10 = arith.constant 0 : index
    %28 = vector.load %arg3[%c0_9, %c0_10] : memref<64x64xbf16, #tpu.memory_space<vmem>>, vector<64x64xbf16>
    %cst_11 = arith.constant dense<0.000000e+00> : vector<64x64xf32>
    %29 = tpu.matmul %27, %28, %cst_11 {dimension_numbers = #tpu.dot_dimension_numbers<[1], [0], [0], [1], [0, 0, 1, 1], [], []>} : vector<64x64xbf16>, vector<64x64xbf16>, vector<64x64xf32> -> vector<64x64xf32>
    %30 = vector.broadcast %1 : vector<1x64xf32> to vector<64x64xf32>
    %31 = arith.addf %29, %30 : vector<64x64xf32>
    %32 = arith.mulf %31, %31 : vector<64x64xf32>
    %33 = tpu.concatenate %25, %26, %32 in 1 : vector<64x32xf32>, vector<64x32xf32>, vector<64x64xf32> -> vector<64x128xf32>
    %34 = arith.truncf %33 : vector<64x128xf32> to vector<64x128xbf16>
    %c0_12 = arith.constant 0 : index
    %c0_13 = arith.constant 0 : index
    %35 = vector.load %arg4[%c0_12, %c0_13] : memref<128x32xbf16, #tpu.memory_space<vmem>>, vector<128x32xbf16>
    %cst_14 = arith.constant dense<0.000000e+00> : vector<64x32xf32>
    %36 = tpu.matmul %34, %35, %cst_14 {dimension_numbers = #tpu.dot_dimension_numbers<[1], [0], [0], [1], [0, 0, 1, 1], [], []>} : vector<64x128xbf16>, vector<128x32xbf16>, vector<64x32xf32> -> vector<64x32xf32>
    %37 = vector.broadcast %4 : vector<1x32xf32> to vector<64x32xf32>
    %38 = arith.addf %36, %37 : vector<64x32xf32>
    %cst_15 = arith.constant 0.000000e+00 : f32
    %39 = vector.broadcast %cst_15 : f32 to vector<64x32xf32>
    %40 = arith.maximumf %38, %39 : vector<64x32xf32>
    %41 = arith.truncf %40 : vector<64x32xf32> to vector<64x32xbf16>
    %c0_16 = arith.constant 0 : index
    %c0_17 = arith.constant 0 : index
    %42 = vector.load %arg5[%c0_16, %c0_17] : memref<32x32xbf16, #tpu.memory_space<vmem>>, vector<32x32xbf16>
    %cst_18 = arith.constant dense<0.000000e+00> : vector<64x32xf32>
    %43 = tpu.matmul %41, %42, %cst_18 {dimension_numbers = #tpu.dot_dimension_numbers<[1], [0], [0], [1], [0, 0, 1, 1], [], []>} : vector<64x32xbf16>, vector<32x32xbf16>, vector<64x32xf32> -> vector<64x32xf32>
    %44 = vector.broadcast %5 : vector<1x32xf32> to vector<64x32xf32>
    %45 = arith.addf %43, %44 : vector<64x32xf32>
    %46 = arith.truncf %45 : vector<64x32xf32> to vector<64x32xbf16>
    %c0_19 = arith.constant 0 : index
    %c0_20 = arith.constant 0 : index
    %47 = vector.load %arg6[%c0_19, %c0_20] : memref<32x32xbf16, #tpu.memory_space<vmem>>, vector<32x32xbf16>
    %cst_21 = arith.constant dense<0.000000e+00> : vector<64x32xf32>
    %48 = tpu.matmul %46, %47, %cst_21 {dimension_numbers = #tpu.dot_dimension_numbers<[1], [0], [0], [1], [0, 0, 1, 1], [], []>} : vector<64x32xbf16>, vector<32x32xbf16>, vector<64x32xf32> -> vector<64x32xf32>
    %49 = vector.broadcast %6 : vector<1x32xf32> to vector<64x32xf32>
    %50 = arith.addf %48, %49 : vector<64x32xf32>
    %cst_22 = arith.constant 0.000000e+00 : f32
    %51 = vector.broadcast %cst_22 : f32 to vector<64x32xf32>
    %52 = arith.maximumf %50, %51 : vector<64x32xf32>
    %53 = arith.truncf %52 : vector<64x32xf32> to vector<64x32xbf16>
    %c0_23 = arith.constant 0 : index
    %c0_24 = arith.constant 0 : index
    %54 = vector.load %arg7[%c0_23, %c0_24] : memref<32x64xbf16, #tpu.memory_space<vmem>>, vector<32x64xbf16>
    %cst_25 = arith.constant dense<0.000000e+00> : vector<64x64xf32>
    %55 = tpu.matmul %53, %54, %cst_25 {dimension_numbers = #tpu.dot_dimension_numbers<[1], [0], [0], [1], [0, 0, 1, 1], [], []>} : vector<64x32xbf16>, vector<32x64xbf16>, vector<64x64xf32> -> vector<64x64xf32>
    %56 = vector.broadcast %2 : vector<1x64xf32> to vector<64x64xf32>
    %57 = arith.addf %55, %56 : vector<64x64xf32>
    %58 = arith.mulf %31, %57 : vector<64x64xf32>
    %c0_26 = arith.constant 0 : index
    %c0_27 = arith.constant 0 : index
    %59 = vector.load %arg2[%c0_26, %c0_27] : memref<16x64xbf16, #tpu.memory_space<vmem>>, vector<16x64xbf16>
    %60 = arith.truncf %45 : vector<64x32xf32> to vector<64x32xbf16>
    %cst_28 = arith.constant dense<0.000000e+00> : vector<16x32xf32>
    %61 = tpu.matmul %59, %60, %cst_28 {dimension_numbers = #tpu.dot_dimension_numbers<[1], [0], [0], [1], [0, 0, 1, 1], [], []>} : vector<16x64xbf16>, vector<64x32xbf16>, vector<16x32xf32> -> vector<16x32xf32>
    %62 = vector.broadcast %15 : vector<16x1xf32> to vector<16x32xf32>
    %63 = arith.mulf %61, %62 : vector<16x32xf32>
    %64 = arith.truncf %58 : vector<64x64xf32> to vector<64x64xbf16>
    %cst_29 = arith.constant dense<0.000000e+00> : vector<16x64xf32>
    %65 = tpu.matmul %59, %64, %cst_29 {dimension_numbers = #tpu.dot_dimension_numbers<[1], [0], [0], [1], [0, 0, 1, 1], [], []>} : vector<16x64xbf16>, vector<64x64xbf16>, vector<16x64xf32> -> vector<16x64xf32>
    %66 = vector.broadcast %15 : vector<16x1xf32> to vector<16x64xf32>
    %67 = arith.mulf %65, %66 : vector<16x64xf32>
    %68 = tpu.concatenate %14, %63 in 1 : vector<16x32xf32>, vector<16x32xf32> -> vector<16x64xf32>
    %69 = arith.truncf %68 : vector<16x64xf32> to vector<16x64xbf16>
    %c0_30 = arith.constant 0 : index
    %c0_31 = arith.constant 0 : index
    %70 = vector.load %arg8[%c0_30, %c0_31] : memref<64x32xbf16, #tpu.memory_space<vmem>>, vector<64x32xbf16>
    %cst_32 = arith.constant dense<0.000000e+00> : vector<16x32xf32>
    %71 = tpu.matmul %69, %70, %cst_32 {dimension_numbers = #tpu.dot_dimension_numbers<[1], [0], [0], [1], [0, 0, 1, 1], [], []>} : vector<16x64xbf16>, vector<64x32xbf16>, vector<16x32xf32> -> vector<16x32xf32>
    %72 = vector.broadcast %7 : vector<1x32xf32> to vector<16x32xf32>
    %73 = arith.addf %71, %72 : vector<16x32xf32>
    %cst_33 = arith.constant 0.000000e+00 : f32
    %74 = vector.broadcast %cst_33 : f32 to vector<16x32xf32>
    %75 = arith.maximumf %73, %74 : vector<16x32xf32>
    %76 = arith.truncf %75 : vector<16x32xf32> to vector<16x32xbf16>
    %c0_34 = arith.constant 0 : index
    %c0_35 = arith.constant 0 : index
    %77 = vector.load %arg9[%c0_34, %c0_35] : memref<32x32xbf16, #tpu.memory_space<vmem>>, vector<32x32xbf16>
    %cst_36 = arith.constant dense<0.000000e+00> : vector<16x32xf32>
    %78 = tpu.matmul %76, %77, %cst_36 {dimension_numbers = #tpu.dot_dimension_numbers<[1], [0], [0], [1], [0, 0, 1, 1], [], []>} : vector<16x32xbf16>, vector<32x32xbf16>, vector<16x32xf32> -> vector<16x32xf32>
    %79 = arith.addf %14, %78 : vector<16x32xf32>
    %80 = vector.broadcast %8 : vector<1x32xf32> to vector<16x32xf32>
    %81 = arith.addf %79, %80 : vector<16x32xf32>
    %82 = arith.truncf %67 : vector<16x64xf32> to vector<16x64xbf16>
    %c0_37 = arith.constant 0 : index
    %c0_38 = arith.constant 0 : index
    %83 = vector.load %arg10[%c0_37, %c0_38] : memref<64x128xbf16, #tpu.memory_space<vmem>>, vector<64x128xbf16>
    %cst_39 = arith.constant dense<0.000000e+00> : vector<16x128xf32>
    %84 = tpu.matmul %82, %83, %cst_39 {dimension_numbers = #tpu.dot_dimension_numbers<[1], [0], [0], [1], [0, 0, 1, 1], [], []>} : vector<16x64xbf16>, vector<64x128xbf16>, vector<16x128xf32> -> vector<16x128xf32>
    %85 = vector.broadcast %10 : vector<1x128xf32> to vector<16x128xf32>
    %86 = arith.addf %84, %85 : vector<16x128xf32>
    %87 = arith.truncf %86 : vector<16x128xf32> to vector<16x128xbf16>
    %c0_40 = arith.constant 0 : index
    %c0_41 = arith.constant 0 : index
    %88 = vector.load %arg11[%c0_40, %c0_41] : memref<128x1024xbf16, #tpu.memory_space<vmem>>, vector<128x1024xbf16>
    %cst_42 = arith.constant dense<0.000000e+00> : vector<16x1024xf32>
    %89 = tpu.matmul %87, %88, %cst_42 {dimension_numbers = #tpu.dot_dimension_numbers<[1], [0], [0], [1], [0, 0, 1, 1], [], []>} : vector<16x128xbf16>, vector<128x1024xbf16>, vector<16x1024xf32> -> vector<16x1024xf32>
    %90 = vector.extract_strided_slice %89 {offsets = [0, 0], sizes = [16, 512], strides = [1, 1]} : vector<16x1024xf32> to vector<16x512xf32>
    %91 = vector.extract_strided_slice %89 {offsets = [0, 512], sizes = [16, 512], strides = [1, 1]} : vector<16x1024xf32> to vector<16x512xf32>
    %92 = arith.mulf %90, %91 : vector<16x512xf32>
    %93 = arith.truncf %92 : vector<16x512xf32> to vector<16x512xbf16>
    %c0_43 = arith.constant 0 : index
    %c0_44 = arith.constant 0 : index
    %94 = vector.load %arg12[%c0_43, %c0_44] : memref<512x64xbf16, #tpu.memory_space<vmem>>, vector<512x64xbf16>
    %cst_45 = arith.constant dense<0.000000e+00> : vector<16x64xf32>
    %95 = tpu.matmul %93, %94, %cst_45 {dimension_numbers = #tpu.dot_dimension_numbers<[1], [0], [0], [1], [0, 0, 1, 1], [], []>} : vector<16x512xbf16>, vector<512x64xbf16>, vector<16x64xf32> -> vector<16x64xf32>
    %96 = arith.truncf %67 : vector<16x64xf32> to vector<16x64xbf16>
    %c0_46 = arith.constant 0 : index
    %c0_47 = arith.constant 0 : index
    %97 = vector.load %arg13[%c0_46, %c0_47] : memref<64x64xbf16, #tpu.memory_space<vmem>>, vector<64x64xbf16>
    %cst_48 = arith.constant dense<0.000000e+00> : vector<16x64xf32>
    %98 = tpu.matmul %96, %97, %cst_48 {dimension_numbers = #tpu.dot_dimension_numbers<[1], [0], [0], [1], [0, 0, 1, 1], [], []>} : vector<16x64xbf16>, vector<64x64xbf16>, vector<16x64xf32> -> vector<16x64xf32>
    %99 = arith.addf %95, %98 : vector<16x64xf32>
    %100 = vector.broadcast %3 : vector<1x64xf32> to vector<16x64xf32>
    %101 = arith.addf %99, %100 : vector<16x64xf32>
    %102 = arith.mulf %101, %101 : vector<16x64xf32>
    %103 = arith.truncf %102 : vector<16x64xf32> to vector<16x64xbf16>
    %c0_49 = arith.constant 0 : index
    %c0_50 = arith.constant 0 : index
    %104 = vector.load %arg14[%c0_49, %c0_50] : memref<64x8xbf16, #tpu.memory_space<vmem>>, vector<64x8xbf16>
    %cst_51 = arith.constant dense<0.000000e+00> : vector<16x8xf32>
    %105 = tpu.matmul %103, %104, %cst_51 {dimension_numbers = #tpu.dot_dimension_numbers<[1], [0], [0], [1], [0, 0, 1, 1], [], []>} : vector<16x64xbf16>, vector<64x8xbf16>, vector<16x8xf32> -> vector<16x8xf32>
    %106 = arith.mulf %105, %105 : vector<16x8xf32>
    %cst_52 = arith.constant 1.000000e-16 : f32
    %107 = vector.broadcast %cst_52 : f32 to vector<16x8xf32>
    %108 = arith.addf %106, %107 : vector<16x8xf32>
    %109 = math.sqrt %108 : vector<16x8xf32>
    %110 = math.sqrt %109 : vector<16x8xf32>
    %cst_53 = arith.constant dense<0.000000e+00> : vector<16xf32>
    %111 = vector.multi_reduction <add>, %110, %cst_53 [1] : vector<16x8xf32> to vector<16xf32>
    %112 = vector.shape_cast %111 : vector<16xf32> to vector<16x1xf32>
    %cst_54 = arith.constant 8.000000e+00 : f32
    %113 = vector.broadcast %cst_54 : f32 to vector<16x1xf32>
    %114 = arith.divf %112, %113 : vector<16x1xf32>
    %cst_55 = arith.constant 9.99999997E-7 : f32
    %115 = vector.broadcast %cst_55 : f32 to vector<16x1xf32>
    %116 = arith.addf %114, %115 : vector<16x1xf32>
    %117 = vector.broadcast %9 : vector<1x64xf32> to vector<16x64xf32>
    %118 = arith.mulf %117, %101 : vector<16x64xf32>
    %119 = tpu.reciprocal %116 {approx = true} : vector<16x1xf32> -> vector<16x1xf32>
    %120 = vector.broadcast %119 : vector<16x1xf32> to vector<16x64xf32>
    %121 = arith.mulf %118, %120 : vector<16x64xf32>
    %122 = arith.addf %121, %13 : vector<16x64xf32>
    %cst_56 = arith.constant 0.000000e+00 : f32
    %123 = vector.broadcast %cst_56 : f32 to vector<16x32xf32>
    %124 = tpu.concatenate %81, %122, %123 in 1 : vector<16x32xf32>, vector<16x64xf32>, vector<16x32xf32> -> vector<16x128xf32>
    %c0_57 = arith.constant 0 : index
    %c0_58 = arith.constant 0 : index
    %125 = vector.load %arg16[%c0_57, %c0_58] : memref<16x128xf32, #tpu.memory_space<vmem>>, vector<16x128xf32>
    tpu.vector_store %arg16[%c0_57, %c0_58], %124 {strides = array<i32>} : memref<16x128xf32, #tpu.memory_space<vmem>>, vector<16x128xf32>,
    return
  }
}

</mosaic_0001>

<bundles_post_ra>
// kernel: egnn_c_block_forward.1
= control target key start
LH: loop header
LB: loop body
LE: loop exit
PB: predicated region body
PF: predicated region fallthrough
CT: control target
= control target key end

     0   :  { %vm86_vm0 = vcmask 130048   ;;  %vm243_vm1 = vcmask 523264   ;;  %s2820_s21 = smov 96   ;;  %vm389_vm2 = vcmask 261120   ;;  %vm1925_vm8 = vcmask 64512   ;;  %s3737_s0 = inlined_call_operand.vmem [shape: f32[16,128], index: 0, kind: input, shape index: {}]   ;;  %s3738_s1 = inlined_call_operand.vmem [shape: bf16[2,64,16], index: 1, kind: input, shape index: {}]   ;;  %s3739_s3 = inlined_call_operand.vmem [shape: bf16[64,64], index: 3, kind: input, shape index: {}]   ;;  %s3740_s15 = inlined_call_operand.vmem [shape: f32[8,128], index: 15, kind: input, shape index: {}]   ;;  %s3741_s4 = inlined_call_operand.vmem [shape: bf16[128,32], index: 4, kind: input, shape index: {}]   ;;  %s3742_s5 = inlined_call_operand.vmem [shape: bf16[32,32], index: 5, kind: input, shape index: {}]   ;;  %s3743_s6 = inlined_call_operand.vmem [shape: bf16[32,32], index: 6, kind: input, shape index: {}]   ;;  %s3744_s7 = inlined_call_operand.vmem [shape: bf16[32,64], index: 7, kind: input, shape index: {}]   ;;  %s3745_s2 = inlined_call_operand.vmem [shape: bf16[16,64], index: 2, kind: input, shape index: {}]   ;;  %s3746_s10 = inlined_call_operand.vmem [shape: bf16[64,128], index: 10, kind: input, shape index: {}]   ;;  %s3747_s8 = inlined_call_operand.vmem [shape: bf16[64,32], index: 8, kind: input, shape index: {}]   ;;  %s3748_s9 = inlined_call_operand.vmem [shape: bf16[32,32], index: 9, kind: input, shape index: {}]   ;;  %s3749_s11 = inlined_call_operand.vmem [shape: bf16[128,1024], index: 11, kind: input, shape index: {}]   ;;  %s3750_s13 = inlined_call_operand.vmem [shape: bf16[64,64], index: 13, kind: input, shape index: {}]   ;;  %s3751_s12 = inlined_call_operand.vmem [shape: bf16[512,64], index: 12, kind: input, shape index: {}]   ;;  %s3752_s14 = inlined_call_operand.vmem [shape: bf16[64,8], index: 14, kind: input, shape index: {}]   ;;  %s3753_s16 = inlined_call_operand.vmem [shape: f32[16,128], index: 16, kind: output, shape index: {}]  }
   0x1   :  { %3755 = sst [smem:[#allocation2_spill]] %s3737_s0  ;;  %v2589_v3 = vld [vmem:[%s3738_s1] sm:$0xff]  ;;  %v2590_v5 = vld [vmem:[%s3738_s1 + $0x8] sm:$0xff]  ;;  %v2600_v7 = vld [vmem:[%s3739_s3 + $0x18] sm:$0xff]  ;;  %vm1977_vm13 = vcmask 785408  }
   0x2   :  { %s3756_s23 = sld [smem:[#allocation2_spill]]  ;;  %v2593_v4 = vld [vmem:[%s3738_s1 + $0x20] sm:$0xff]  ;;  %v2594_v6 = vld [vmem:[%s3738_s1 + $0x28] sm:$0xff]  ;;  %260 = vmatpush.bf16.msra.mxu2 %v2600_v7  ;;  %v2591_v8 = vld [vmem:[%s3738_s1 + $0x10] sm:$0xff] }
   0x3   :  { %v2595_v9 = vld [vmem:[%s3738_s1 + $0x30] sm:$0xff]  ;;  %v2592_v10 = vld [vmem:[%s3738_s1 + $0x18] sm:$0xff]  ;;  %v2598_v13 = vld [vmem:[%s3739_s3 + $0x8] sm:$0xff] }
   0x4   :  { %v2596_v11 = vld [vmem:[%s3738_s1 + $0x38] sm:$0xff]  ;;  %v2599_v12 = vld [vmem:[%s3739_s3 + $0x10] sm:$0xff]  ;;  %v2597_v14 = vld [vmem:[%s3739_s3] sm:$0xff]  ;;  %s2819_s1 = smov 64  }
   0x5   :  { %v2977_v50 = vld [vmem:[%s3740_s15] sm:$0xff]  ;;  %v2607_v7 = vld [vmem:[%s3741_s4 + $0x30] sm:$0xff] }
   0x6   :  { %261 = vmatpush.bf16.msra.mxu2 %v2599_v12  ;;  %v2980_v51 = vperm.slane %v2977_v50, 1  ;;  %v218_v53 = vperm.slane %v2977_v50, 0 }
   0x8   :  { %v2912_v0 = vld [vmem:[%s3756_s23] sm:$0xff]  ;;  %v2917_v1 = vld [vmem:[%s3756_s23 + $0x8] sm:$0xff] }
   0x9   :  { %v57_v2 = vpack.c.bf16 %v2917_v1, %v2912_v0 }
   0xa   :  { %262 = vmatpush.bf16.msra.mxu2 %v2598_v13 }
   0xb   :  { %106 = vmatpush.bf16.msra.mxu0 %v57_v2  ;;  %176 = vmatpush.bf16.msra.mxu1 %v57_v2 }
   0xe   :  { %2002 = vmatmul.msk.bf16.vlgmr.msra.gmra.mxu0 %vm86_vm0, %v2589_v3  ;;  %2030 = vmatmul.msk.bf16.vlgmr.msra.gmra.mxu1 %vm86_vm0, %v2593_v4 }
   0xf   :  { %263 = vmatpush.bf16.msra.mxu2 %v2597_v14  ;;  %v2605_v14 = vld [vmem:[%s3741_s4 + $0x20] sm:$0xff] }
  0x1e   :  { %2003 = vmatmul.msk.bf16.gmra.mxu0 %vm86_vm0, %v2590_v5  ;;  %2031 = vmatmul.msk.bf16.gmra.mxu1 %vm86_vm0, %v2594_v6  ;;  %v2608_v5 = vld [vmem:[%s3741_s4 + $0x38] sm:$0xff] }
  0x1f   :  { %475 = vmatpush.bf16.msra.mxu3 %v2608_v5 }
  0x23   :  { %476 = vmatpush.bf16.msra.mxu3 %v2607_v7 }
  0x2e   :  { %2004 = vmatmul.msk.bf16.gmra.mxu0 %vm86_vm0, %v2591_v8  ;;  %2032 = vmatmul.msk.bf16.gmra.mxu1 %vm86_vm0, %v2595_v9 }
  0x3e   :  { %2005 = vmatmul.msk.bf16.gmra.mxu0 %vm86_vm0, %v2592_v10  ;;  %2033 = vmatmul.msk.bf16.gmra.mxu1 %vm86_vm0, %v2596_v11  ;;  %v2606_v10 = vld [vmem:[%s3741_s4 + $0x28] sm:$0xff] }
  0x3f   :  { %477 = vmatpush.bf16.msra.mxu3 %v2606_v10 }
  0x43   :  { %478 = vmatpush.bf16.msra.mxu3 %v2605_v14 }
  0x8b   :  { %v108_v15 = vpop.f32.mrf.mxu0  ;;  %v178_v16 = vpop.f32.mrf.mxu1 }
  0x8c   :  { %v198_v19 = vsub.f32 %v178_v16, %v108_v15 }
  0x93   :  { %v110_v17 = vpop.f32.mrf.mxu0  ;;  %v180_v18 = vpop.f32.mrf.mxu1 }
  0x94   :  { %v199_v20 = vsub.f32 %v180_v18, %v110_v17  ;;  %v2735_v21 = vpack.i.bf16 %v110_v17, %v108_v15  ;;  %v2740_v25 = vpack.i.bf16 %v180_v18, %v178_v16  ;;  %v2604_v17 = vld [vmem:[%s3741_s4 + $0x18] sm:$0xff] }
  0x95   :  { %479 = vmatpush.bf16.msra.mxu3 %v2604_v17 }
  0x96   :  { %v206_v22 = vpack.c.bf16 %v199_v20, %v198_v19  ;;  %2736 = vrot.lane.b32.xlu0 %v2735_v21, %s2819_s1  ;;  %v2603_v19 = vld [vmem:[%s3741_s4 + $0x10] sm:$0xff]  ;;  %v2602_v21 = vld [vmem:[%s3741_s4 + $0x8] sm:$0xff] }
  0x98   :  { %2050 = vmatmul.msk.bf16.vlgmr.msra.gmra.mxu2 %vm243_vm1, %v206_v22 }
  0x99   :  { %480 = vmatpush.bf16.msra.mxu3 %v2603_v19 }
  0x9b   :  { %v113_v23 = vpop.f32.mrf.mxu0  ;;  %v183_v24 = vpop.f32.mrf.mxu1 }
  0x9c   :  { %v200_v26 = vsub.f32 %v183_v24, %v113_v23 }
  0x9d   :  { %481 = vmatpush.bf16.msra.mxu3 %v2602_v21 }
  0x9e   :  { %2741 = vrot.lane.b32.xlu0 %v2740_v25, %s2820_s21 }
  0xa3   :  { %v115_v27 = vpop.f32.mrf.mxu0  ;;  %v185_v28 = vpop.f32.mrf.mxu1 }
  0xa4   :  { %v2750_v29 = vpack.i.bf16 %v115_v27, %v113_v23  ;;  %v201_v30 = vsub.f32 %v185_v28, %v115_v27  ;;  %v2755_v31 = vpack.i.bf16 %v185_v28, %v183_v24  ;;  %v2601_v27 = vld [vmem:[%s3741_s4] sm:$0xff] }
  0xa5   :  { %482 = vmatpush.bf16.msra.mxu3 %v2601_v27 }
  0xa6   :  { %v207_v32 = vpack.c.bf16 %v201_v30, %v200_v26  ;;  %2756 = vrot.lane.b32.xlu2 %v2755_v31, %s2820_s21 }
  0xa8   :  { %2051 = vmatmul.msk.bf16.gmra.mxu2 %vm243_vm1, %v207_v32 }
  0xab   :  { %v118_v33 = vpop.f32.mrf.mxu0  ;;  %v188_v34 = vpop.f32.mrf.mxu1 }
  0xac   :  { %v202_v35 = vsub.f32 %v188_v34, %v118_v33 }
  0xb3   :  { %v120_v36 = vpop.f32.mrf.mxu0  ;;  %v190_v37 = vpop.f32.mrf.mxu1 }
  0xb4   :  { %v2765_v38 = vpack.i.bf16 %v120_v36, %v118_v33  ;;  %v2770_v39 = vpack.i.bf16 %v190_v37, %v188_v34  ;;  %v203_v40 = vsub.f32 %v190_v37, %v120_v36 }
  0xb6   :  { %v208_v41 = vpack.c.bf16 %v203_v40, %v202_v35  ;;  %2766 = vrot.lane.b32.xlu0 %v2765_v38, %s2819_s1 }
  0xb8   :  { %2052 = vmatmul.msk.bf16.gmra.mxu2 %vm243_vm1, %v208_v41 }
  0xbb   :  { %v123_v42 = vpop.f32.mrf.mxu0  ;;  %v193_v43 = vpop.f32.mrf.mxu1 }
  0xbc   :  { %v204_v44 = vsub.f32 %v193_v43, %v123_v42 }
  0xc3   :  { %v125_v45 = vpop.f32.mrf.mxu0  ;;  %v195_v46 = vpop.f32.mrf.mxu1 }
  0xc4   :  { %v2780_v47 = vpack.i.bf16 %v125_v45, %v123_v42  ;;  %v205_v48 = vsub.f32 %v195_v46, %v125_v45  ;;  %v2785_v8 = vpack.i.bf16 %v195_v46, %v193_v43 }
  0xc6   :  { %v209_v49 = vpack.c.bf16 %v205_v48, %v204_v44  ;;  %2781 = vrot.lane.b32.xlu0 %v2780_v47, %s2819_s1 }
  0xc8   :  { %2053 = vmatmul.msk.bf16.gmra.mxu2 %vm243_vm1, %v209_v49 }
  0xce   :  { %533 = vrot.lane.b32.xlu0 %v2980_v51, %s2820_s21 }
 0x100   :  { %v2757_v41 = vpop.permute.xlu2 %2756 }
 0x101   :  { %v2759_v46 = vunpack.i.h.bf16 %v2757_v41  ;;  %v2758_v47 = vunpack.i.l.bf16 %v2757_v41 }
 0x108   :  { %v2737_v28 = vpop.permute.xlu0 %2736 }
 0x109   :  { %v2739_v32 = vunpack.i.h.bf16 %v2737_v28  ;;  %v2738_v33 = vunpack.i.l.bf16 %v2737_v28 }
 0x11b   :  { %v265_v52 = vpop.f32.mrf.mxu2 }
 0x11c   :  { %v2985_v54 = vadd.f32 %v265_v52, %v218_v53 }
 0x11e   :  { %v285_v57 = vmul.f32 %v2985_v54, %v2985_v54 }
 0x123   :  { %v267_v55 = vpop.f32.mrf.mxu2 }
 0x124   :  { %v2987_v56 = vadd.f32 %v267_v55, %v218_v53 }
 0x126   :  { %v286_v58 = vmul.f32 %v2987_v56, %v2987_v56 }
 0x128   :  { %v2745_v59 = vpack.i.bf16 %v286_v58, %v285_v57 }
 0x12a   :  { %2746 = vrot.lane.b32.xlu1 %v2745_v59, %s2819_s1 }
 0x12b   :  { %v270_v60 = vpop.f32.mrf.mxu2 }
 0x12c   :  { %v2994_v61 = vadd.f32 %v270_v60, %v218_v53  ;;  %v2610_v60 = vld [vmem:[%s3742_s5 + $0x8] sm:$0xff] }
 0x12d   :  { %554 = vmatpush.bf16.msrb.mxu0 %v2610_v60 }
 0x12e   :  { %v287_v63 = vmul.f32 %v2994_v61, %v2994_v61 }
 0x132   :  { %2751 = vrot.lane.b32.xlu1 %v2750_v29, %s2819_s1  ;;  %v2742_v29 = vpop.permute.xlu0 %2741 }
 0x133   :  { %v272_v62 = vpop.f32.mrf.mxu2  ;;  %v2744_v30 = vunpack.i.h.bf16 %v2742_v29  ;;  %v2743_v31 = vunpack.i.l.bf16 %v2742_v29 }
 0x134   :  { %v2999_v2 = vadd.f32 %v272_v62, %v218_v53 }
 0x135   :  { %v390_v37 = vsel %vm389_vm2, %v2738_v33, %v2743_v31  ;;  %v391_v38 = vsel %vm389_vm2, %v2739_v32, %v2744_v30 }
 0x136   :  { %v288_v3 = vmul.f32 %v2999_v2, %v2999_v2 }
 0x138   :  { %v2760_v4 = vpack.i.bf16 %v288_v3, %v287_v63  ;;  %v2609_v63 = vld [vmem:[%s3742_s5] sm:$0xff] }
 0x139   :  { %555 = vmatpush.bf16.msrb.mxu0 %v2609_v63 }
 0x13a   :  { %2771 = vrot.lane.b32.xlu1 %v2770_v39, %s2820_s21  ;;  %2761 = vrot.lane.b32.xlu2 %v2760_v4, %s2819_s1  ;;  %v2767_v3 = vpop.permute.xlu0 %2766 }
 0x13b   :  { %v275_v6 = vpop.f32.mrf.mxu2  ;;  %v2769_v7 = vunpack.i.h.bf16 %v2767_v3 }
 0x13c   :  { %v3011_v9 = vadd.f32 %v275_v6, %v218_v53 }
 0x13e   :  { %v289_v12 = vmul.f32 %v3011_v9, %v3011_v9 }
 0x142   :  { %2786 = vrot.lane.b32.xlu1 %v2785_v8, %s2820_s21  ;;  %v2768_v8 = vunpack.i.l.bf16 %v2767_v3  ;;  %v2782_v19 = vpop.permute.xlu0 %2781 }
 0x143   :  { %v277_v11 = vpop.f32.mrf.mxu2 }
 0x144   :  { %v3019_v13 = vadd.f32 %v277_v11, %v218_v53 }
 0x146   :  { %v290_v15 = vmul.f32 %v3019_v13, %v3019_v13 }
 0x148   :  { %v2775_v16 = vpack.i.bf16 %v290_v15, %v289_v12 }
 0x14a   :  { %2776 = vrot.lane.b32.xlu2 %v2775_v16, %s2819_s1  ;;  %597 = vrot.lane.b32.xlu1 %v2980_v51, %s2819_s1 }
 0x14b   :  { %v280_v18 = vpop.f32.mrf.mxu2 }
 0x14c   :  { %v3035_v20 = vadd.f32 %v280_v18, %v218_v53 }
 0x14e   :  { %v291_v23 = vmul.f32 %v3035_v20, %v3035_v20 }
 0x152   :  { %775 = vrot.lane.b32.xlu1 %v2912_v0, %s2819_s1 }
 0x153   :  { %v282_v22 = vpop.f32.mrf.mxu2 }
 0x154   :  { %v3044_v24 = vadd.f32 %v282_v22, %v218_v53 }
 0x156   :  { %v292_v25 = vmul.f32 %v3044_v24, %v3044_v24 }
 0x158   :  { %v2790_v26 = vpack.i.bf16 %v292_v25, %v291_v23  ;;  %v2784_v25 = vunpack.i.h.bf16 %v2782_v19 }
 0x15a   :  { %2791 = vrot.lane.b32.xlu2 %v2790_v26, %s2819_s1  ;;  %v2783_v26 = vunpack.i.l.bf16 %v2782_v19 }
 0x194   :  { %v2762_v48 = vpop.permute.xlu2 %2761 }
 0x195   :  { %v2764_v53 = vunpack.i.h.bf16 %v2762_v48  ;;  %v2763_v55 = vunpack.i.l.bf16 %v2762_v48  ;;  %v2612_v48 = vld [vmem:[%s3743_s6 + $0x8] sm:$0xff] }
 0x196   :  { %618 = vmatpush.bf16.msrb.mxu1 %v2612_v48 }
 0x19c   :  { %v2747_v34 = vpop.permute.xlu1 %2746 }
 0x19d   :  { %v2749_v35 = vunpack.i.h.bf16 %v2747_v34  ;;  %v2748_v36 = vunpack.i.l.bf16 %v2747_v34 }
 0x19f   :  { %v398_v39 = vsel %vm243_vm1, %v390_v37, %v2748_v36  ;;  %v399_v40 = vsel %vm243_vm1, %v391_v38, %v2749_v35 }
 0x1a0   :  { %v406_v42 = vpack.c.bf16 %v399_v40, %v398_v39 }
 0x1a2   :  { %483 = vmatmul.bf16.vlgmr.msra.gmra.mxu3 %v406_v42 }
 0x1a4   :  { %v2752_v43 = vpop.permute.xlu1 %2751  ;;  %v2777_v6 = vpop.permute.xlu2 %2776 }
 0x1a5   :  { %v2754_v44 = vunpack.i.h.bf16 %v2752_v43  ;;  %v2753_v45 = vunpack.i.l.bf16 %v2752_v43  ;;  %v2779_v10 = vunpack.i.h.bf16 %v2777_v6  ;;  %v2778_v11 = vunpack.i.l.bf16 %v2777_v6 }
 0x1a7   :  { %v392_v49 = vsel %vm389_vm2, %v2753_v45, %v2758_v47  ;;  %v393_v52 = vsel %vm389_vm2, %v2754_v44, %v2759_v46 }
 0x1a8   :  { %v400_v57 = vsel %vm243_vm1, %v392_v49, %v2763_v55  ;;  %v401_v58 = vsel %vm243_vm1, %v393_v52, %v2764_v53  ;;  %v2611_v52 = vld [vmem:[%s3743_s6] sm:$0xff] }
 0x1a9   :  { %v407_v59 = vpack.c.bf16 %v401_v58, %v400_v57  ;;  %619 = vmatpush.bf16.msrb.mxu1 %v2611_v52  ;;  %v3107_v52 = vld [vmem:[%s3745_s2] sm:$0xff]  ;;  %s2822_s2 = smov 32  }
 0x1ac   :  { %v2772_v62 = vpop.permute.xlu1 %2771 }
 0x1ad   :  { %v2774_v4 = vunpack.i.h.bf16 %v2772_v62  ;;  %v2773_v5 = vunpack.i.l.bf16 %v2772_v62 }
 0x1af   :  { %v394_v12 = vsel %vm389_vm2, %v2768_v8, %v2773_v5  ;;  %v395_v14 = vsel %vm389_vm2, %v2769_v7, %v2774_v4 }
 0x1b0   :  { %v402_v15 = vsel %vm243_vm1, %v394_v12, %v2778_v11  ;;  %v403_v16 = vsel %vm243_vm1, %v395_v14, %v2779_v10  ;;  %v534_v10 = vpop.permute.xlu0 %533 }
 0x1b1   :  { %v408_v17 = vpack.c.bf16 %v403_v16, %v402_v15 }
 0x1b2   :  { %488 = vmatmul.bf16.gmra.mxu3 %v407_v59 }
 0x1b4   :  { %v2787_v18 = vpop.permute.xlu1 %2786  ;;  %v2792_v23 = vpop.permute.xlu2 %2791 }
 0x1b5   :  { %v2789_v21 = vunpack.i.h.bf16 %v2787_v18  ;;  %v2788_v22 = vunpack.i.l.bf16 %v2787_v18  ;;  %v2794_v27 = vunpack.i.h.bf16 %v2792_v23  ;;  %v2793_v28 = vunpack.i.l.bf16 %v2792_v23 }
 0x1b7   :  { %v396_v29 = vsel %vm389_vm2, %v2783_v26, %v2788_v22  ;;  %v397_v30 = vsel %vm389_vm2, %v2784_v25, %v2789_v21 }
 0x1b8   :  { %v404_v31 = vsel %vm243_vm1, %v396_v29, %v2793_v28  ;;  %v405_v32 = vsel %vm243_vm1, %v397_v30, %v2794_v27  ;;  %v2614_v27 = vld [vmem:[%s3744_s7 + $0x8] sm:$0xff]  ;;  %v2613_v29 = vld [vmem:[%s3744_s7] sm:$0xff] }
 0x1b9   :  { %v409_v33 = vpack.c.bf16 %v405_v32, %v404_v31  ;;  %688 = vmatpush.bf16.msrb.mxu2 %v2614_v27 }
 0x1bd   :  { %689 = vmatpush.bf16.msrb.mxu2 %v2613_v29 }
 0x1c2   :  { %493 = vmatmul.bf16.gmra.mxu3 %v408_v17 }
 0x1d2   :  { %498 = vmatmul.bf16.gmra.mxu3 %v409_v33 }
 0x225   :  { %v484_v34 = vpop.f32.mrf.mxu3 }
 0x226   :  { %v485_v35 = vadd.f32 %v484_v34, %v2980_v51 }
 0x228   :  { %v504_v38 = vmax.f32 %v485_v35, 0.0 }
 0x22d   :  { %v486_v36 = vpop.f32.mrf.mxu3 }
 0x22e   :  { %v487_v37 = vadd.f32 %v486_v36, %v2980_v51  ;;  %v598_v36 = vpop.permute.xlu1 %597 }
 0x230   :  { %v505_v39 = vmax.f32 %v487_v37, 0.0 }
 0x232   :  { %v512_v40 = vpack.c.bf16 %v505_v39, %v504_v38 }
 0x234   :  { %2094 = vmatmul.msk.bf16.vlgmr.msrb.gmra.mxu0 %vm389_vm2, %v512_v40 }
 0x235   :  { %v489_v41 = vpop.f32.mrf.mxu3 }
 0x236   :  { %v490_v42 = vadd.f32 %v489_v41, %v2980_v51 }
 0x238   :  { %v506_v45 = vmax.f32 %v490_v42, 0.0 }
 0x23d   :  { %v491_v43 = vpop.f32.mrf.mxu3 }
 0x23e   :  { %v492_v44 = vadd.f32 %v491_v43, %v2980_v51 }
 0x240   :  { %v507_v46 = vmax.f32 %v492_v44, 0.0 }
 0x242   :  { %v513_v47 = vpack.c.bf16 %v507_v46, %v506_v45 }
 0x244   :  { %2095 = vmatmul.msk.bf16.gmra.mxu0 %vm389_vm2, %v513_v47 }
 0x245   :  { %v494_v49 = vpop.f32.mrf.mxu3 }
 0x246   :  { %v495_v53 = vadd.f32 %v494_v49, %v2980_v51 }
 0x248   :  { %v508_v58 = vmax.f32 %v495_v53, 0.0 }
 0x24d   :  { %v496_v55 = vpop.f32.mrf.mxu3 }
 0x24e   :  { %v497_v57 = vadd.f32 %v496_v55, %v2980_v51  ;;  %v2821_v55 = vmov 96  }
 0x24f   :  { %2796 = vset.pattern.permute.xlu0 %v2821_v55  ;;  %2795 = vset.pattern.permute.xlu2 %v2821_v55 }
 0x250   :  { %v509_v59 = vmax.f32 %v497_v57, 0.0  ;;  %750 = vperm.xlu0 %2796, %v2917_v1   ;;  %745 = vperm.xlu2 %2795, %v2912_v0  }
 0x252   :  { %v514_v60 = vpack.c.bf16 %v509_v59, %v508_v58  ;;  %v657_v58 = vperm.slane %v2977_v50, 2 }
 0x254   :  { %2096 = vmatmul.msk.bf16.gmra.mxu0 %vm389_vm2, %v514_v60 }
 0x255   :  { %v499_v62 = vpop.f32.mrf.mxu3 }
 0x256   :  { %v500_v63 = vadd.f32 %v499_v62, %v2980_v51 }
 0x258   :  { %v510_v5 = vmax.f32 %v500_v63, 0.0  ;;  %1816 = vrot.lane.b32.xlu0 %v657_v58, %s2819_s1  ;;  %777 = vrot.lane.b32.xlu2 %v2917_v1, %s2819_s1 }
 0x25d   :  { %v501_v3 = vpop.f32.mrf.mxu3 }
 0x25e   :  { %v502_v4 = vadd.f32 %v501_v3, %v2980_v51 }
 0x260   :  { %v511_v6 = vmax.f32 %v502_v4, 0.0  ;;  %824 = vrot.lane.b32.xlu2 %v2980_v51, %s2822_s2  ;;  %v2625_v51 = vld [vmem:[%s3746_s10 + $0x18] sm:$0xff] }
 0x261   :  { %938 = vmatpush.bf16.msra.mxu1 %v2625_v51 }
 0x262   :  { %v515_v7 = vpack.c.bf16 %v511_v6, %v510_v5 }
 0x264   :  { %2097 = vmatmul.msk.bf16.gmra.mxu0 %vm389_vm2, %v515_v7 }
 0x2b1   :  { %v557_v8 = vpop.f32.mrf.mxu0 }
 0x2b2   :  { %v558_v12 = vadd.f32 %v557_v8, %v534_v10 }
 0x2b9   :  { %v559_v11 = vpop.f32.mrf.mxu0 }
 0x2ba   :  { %v560_v14 = vadd.f32 %v559_v11, %v534_v10 }
 0x2bc   :  { %v577_v15 = vpack.c.bf16 %v560_v14, %v558_v12 }
 0x2be   :  { %2106 = vmatmul.msk.bf16.vlgmr.msrb.gmra.mxu1 %vm389_vm2, %v577_v15 }
 0x2c1   :  { %v562_v16 = vpop.f32.mrf.mxu0 }
 0x2c2   :  { %v563_v18 = vadd.f32 %v562_v16, %v534_v10  ;;  %v3122_v16 = vpop.permute.xlu2 %745 }
 0x2c9   :  { %v564_v17 = vpop.f32.mrf.mxu0 }
 0x2ca   :  { %v565_v19 = vadd.f32 %v564_v17, %v534_v10 }
 0x2cc   :  { %v578_v21 = vpack.c.bf16 %v565_v19, %v563_v18 }
 0x2ce   :  { %2107 = vmatmul.msk.bf16.gmra.mxu1 %vm389_vm2, %v578_v21 }
 0x2d1   :  { %v567_v22 = vpop.f32.mrf.mxu0 }
 0x2d2   :  { %v568_v25 = vadd.f32 %v567_v22, %v534_v10 }
 0x2d9   :  { %v569_v23 = vpop.f32.mrf.mxu0 }
 0x2da   :  { %v570_v26 = vadd.f32 %v569_v23, %v534_v10 }
 0x2dc   :  { %v579_v28 = vpack.c.bf16 %v570_v26, %v568_v25  ;;  %v2624_v26 = vld [vmem:[%s3746_s10 + $0x10] sm:$0xff] }
 0x2dd   :  { %939 = vmatpush.bf16.msra.mxu1 %v2624_v26  ;;  %v2367_v26 = vld [vmem:[%s3749_s11 + $0x1a0] sm:$0xf0] }
 0x2de   :  { %2108 = vmatmul.msk.bf16.gmra.mxu1 %vm389_vm2, %v579_v28 }
 0x2e1   :  { %v572_v30 = vpop.f32.mrf.mxu0 }
 0x2e2   :  { %v573_v32 = vadd.f32 %v572_v30, %v534_v10 }
 0x2e9   :  { %v574_v31 = vpop.f32.mrf.mxu0 }
 0x2ea   :  { %v575_v33 = vadd.f32 %v574_v31, %v534_v10 }
 0x2ec   :  { %v580_v34 = vpack.c.bf16 %v575_v33, %v573_v32 }
 0x2ee   :  { %2109 = vmatmul.msk.bf16.gmra.mxu1 %vm389_vm2, %v580_v34  ;;  %733 = vmatpush.bf16.msrb.mxu3 %v580_v34 }
 0x2f2   :  { %734 = vmatpush.bf16.msrb.mxu3 %v579_v28 }
 0x2f6   :  { %735 = vmatpush.bf16.msrb.mxu3 %v578_v21 }
 0x2fa   :  { %736 = vmatpush.bf16.msrb.mxu3 %v577_v15  ;;  %v3120_v15 = vpop.permute.xlu0 %750 }
 0x2fd   :  { %2126 = vmatmul.msk.bf16.vlgmr.msrb.gmra.mxu3 %vm243_vm1, %v3107_v52 }
 0x33b   :  { %v621_v35 = vpop.f32.mrf.mxu1 }
 0x33c   :  { %v622_v37 = vadd.f32 %v621_v35, %v598_v36 }
 0x33e   :  { %v641_v40 = vmax.f32 %v622_v37, 0.0 }
 0x343   :  { %v623_v38 = vpop.f32.mrf.mxu1 }
 0x344   :  { %v624_v39 = vadd.f32 %v623_v38, %v598_v36 }
 0x346   :  { %v642_v41 = vmax.f32 %v624_v39, 0.0 }
 0x348   :  { %v649_v42 = vpack.c.bf16 %v642_v41, %v641_v40 }
 0x34a   :  { %2118 = vmatmul.msk.bf16.vlgmr.msrb.gmra.mxu2 %vm389_vm2, %v649_v42 }
 0x34b   :  { %v626_v43 = vpop.f32.mrf.mxu1 }
 0x34c   :  { %v627_v44 = vadd.f32 %v626_v43, %v598_v36 }
 0x34e   :  { %v643_v47 = vmax.f32 %v627_v44, 0.0 }
 0x353   :  { %v628_v45 = vpop.f32.mrf.mxu1 }
 0x354   :  { %v629_v46 = vadd.f32 %v628_v45, %v598_v36  ;;  %v2622_v45 = vld [vmem:[%s3746_s10] sm:$0xff] }
 0x356   :  { %v644_v48 = vmax.f32 %v629_v46, 0.0  ;;  %v3160_v46 = vpop.permute.xlu1 %775 }
 0x358   :  { %v650_v49 = vpack.c.bf16 %v644_v48, %v643_v47  ;;  %v3162_v48 = vpop.permute.xlu2 %777 }
 0x35a   :  { %2119 = vmatmul.msk.bf16.gmra.mxu2 %vm389_vm2, %v650_v49 }
 0x35b   :  { %v631_v53 = vpop.f32.mrf.mxu1 }
 0x35c   :  { %v632_v57 = vadd.f32 %v631_v53, %v598_v36 }
 0x35e   :  { %v645_v62 = vmax.f32 %v632_v57, 0.0 }
 0x363   :  { %v633_v59 = vpop.f32.mrf.mxu1 }
 0x364   :  { %v634_v60 = vadd.f32 %v633_v59, %v598_v36  ;;  %v2397_v59 = vld [vmem:[%s3749_s11 + $0x1c0] sm:$0xf] }
 0x366   :  { %v646_v63 = vmax.f32 %v634_v60, 0.0  ;;  %v2686_v60 = vld [vmem:[%s3749_s11 + $0x1dc] sm:$0xf0] }
 0x368   :  { %v651_v3 = vpack.c.bf16 %v646_v63, %v645_v62  ;;  %v2398_v62 = vor.u32 %v2686_v60, %v2397_v59  ;;  %v2365_v63 = vld [vmem:[%s3749_s11 + $0x180] sm:$0xf] }
 0x36a   :  { %2120 = vmatmul.msk.bf16.gmra.mxu2 %vm389_vm2, %v651_v3  ;;  %v2678_v3 = vld [vmem:[%s3749_s11 + $0x19c] sm:$0xf0] }
 0x36b   :  { %v636_v4 = vpop.f32.mrf.mxu1  ;;  %1333 = vmatpush.bf16.msra.mxu2 %v2398_v62  ;;  %v2279_v62 = vld [vmem:[%s3749_s11 + $0xe8] sm:$0xf0] }
 0x36c   :  { %v637_v5 = vadd.f32 %v636_v4, %v598_v36  ;;  %v2333_v4 = vld [vmem:[%s3749_s11 + $0x140] sm:$0xf] }
 0x36e   :  { %v647_v0 = vmax.f32 %v637_v5, 0.0  ;;  %v2620_v5 = vld [vmem:[%s3748_s9] sm:$0xff] }
 0x373   :  { %v638_v6 = vpop.f32.mrf.mxu1 }
 0x374   :  { %v639_v7 = vadd.f32 %v638_v6, %v598_v36  ;;  %v2682_v6 = vld [vmem:[%s3749_s11 + $0x1c4] sm:$0xf] }
 0x376   :  { %v648_v8 = vmax.f32 %v639_v7, 0.0  ;;  %v2366_v7 = vor.u32 %v2678_v3, %v2365_v63  ;;  %v2237_v63 = vld [vmem:[%s3749_s11 + $0x80] sm:$0xf] }
 0x377   :  { %v2646_v3 = vld [vmem:[%s3749_s11 + $0x9c] sm:$0xf0] }
 0x378   :  { %v652_v10 = vpack.c.bf16 %v648_v8, %v647_v0  ;;  %v2399_v0 = vld [vmem:[%s3749_s11 + $0x1e0] sm:$0xf0]  ;;  %v2405_v8 = vld [vmem:[%s3749_s11 + $0x1c8] sm:$0xf]  ;;  %1334 = vmatpush.bf16.msra.mxu2 %v2366_v7 }
 0x379   :  { %v2239_v7 = vld [vmem:[%s3749_s11 + $0xa0] sm:$0xf0] }
 0x37a   :  { %2121 = vmatmul.msk.bf16.gmra.mxu2 %vm389_vm2, %v652_v10  ;;  %v2687_v10 = vld [vmem:[%s3749_s11 + $0x1e4] sm:$0xf0] }
 0x380   :  { %v738_v12 = vpop.f32.mrf.mxu3 }
 0x381   :  { %v753_v18 = vmul.f32 %v3122_v16, %v738_v12  ;;  %v2683_v12 = vld [vmem:[%s3749_s11 + $0x1cc] sm:$0xf] }
 0x388   :  { %v740_v19 = vpop.f32.mrf.mxu3 }
 0x389   :  { %v754_v21 = vmul.f32 %v3120_v15, %v740_v19 }
 0x38b   :  { %v2797_v22 = vpack.i.bf16 %v754_v21, %v753_v18 }
 0x38d   :  { %2798 = vrot.lane.b32.xlu1 %v2797_v22, %s2822_s2 }
 0x3cd   :  { %v691_v50 = vpop.f32.mrf.mxu2 }
 0x3ce   :  { %v692_v42 = vadd.f32 %v691_v50, %v657_v58  ;;  %v2670_v50 = vld [vmem:[%s3749_s11 + $0x15c] sm:$0xf0] }
 0x3cf   :  { %v2334_v18 = vor.u32 %v2670_v50, %v2333_v4  ;;  %v2247_v50 = vld [vmem:[%s3749_s11 + $0xa8] sm:$0xf0] }
 0x3d1   :  { %1335 = vmatpush.bf16.msra.mxu2 %v2334_v18  ;;  %v2634_v18 = vld [vmem:[%s3749_s11 + $0x44] sm:$0xf] }
 0x3d5   :  { %v693_v11 = vpop.f32.mrf.mxu2 }
 0x3d6   :  { %v694_v39 = vadd.f32 %v693_v11, %v657_v58  ;;  %v2402_v11 = vor.u32 %v2682_v6, %v2399_v0  ;;  %v2642_v6 = vld [vmem:[%s3749_s11 + $0x84] sm:$0xf]  ;;  %v2245_v0 = vld [vmem:[%s3749_s11 + $0x88] sm:$0xf] }
 0x3dd   :  { %v696_v1 = vpop.f32.mrf.mxu2 }
 0x3de   :  { %v697_v37 = vadd.f32 %v696_v1, %v657_v58  ;;  %v2406_v1 = vor.u32 %v2687_v10, %v2405_v8  ;;  %v2647_v8 = vld [vmem:[%s3749_s11 + $0xa4] sm:$0xf0]  ;;  %v2643_v10 = vld [vmem:[%s3749_s11 + $0x8c] sm:$0xf] }
 0x3e0   :  { %v713_v43 = vmul.f32 %v697_v37, %v2994_v61  ;;  %v2623_v61 = vld [vmem:[%s3746_s10 + $0x8] sm:$0xff] }
 0x3e1   :  { %940 = vmatpush.bf16.msra.mxu1 %v2623_v61  ;;  %v2341_v37 = vld [vmem:[%s3749_s11 + $0x148] sm:$0xf]  ;;  %v2269_v61 = vld [vmem:[%s3749_s11 + $0xc0] sm:$0xf] }
 0x3e5   :  { %v698_v14 = vpop.f32.mrf.mxu2  ;;  %941 = vmatpush.bf16.msra.mxu1 %v2622_v45 }
 0x3e6   :  { %v699_v34 = vadd.f32 %v698_v14, %v657_v58  ;;  %v2407_v14 = vld [vmem:[%s3749_s11 + $0x1e8] sm:$0xf0] }
 0x3e8   :  { %v714_v40 = vmul.f32 %v699_v34, %v2999_v2  ;;  %v2618_v2 = vld [vmem:[%s3747_s8 + $0x10] sm:$0xff]  ;;  %v2666_v34 = vld [vmem:[%s3749_s11 + $0x144] sm:$0xf] }
 0x3ea   :  { %v756_v44 = vpack.c.bf16 %v714_v40, %v713_v43  ;;  %v2309_v43 = vld [vmem:[%s3749_s11 + $0x108] sm:$0xf] }
 0x3ed   :  { %v701_v17 = vpop.f32.mrf.mxu2 }
 0x3ee   :  { %v702_v31 = vadd.f32 %v701_v17, %v657_v58  ;;  %v2410_v17 = vor.u32 %v2683_v12, %v2407_v14  ;;  %v2205_v12 = vld [vmem:[%s3749_s11 + $0x40] sm:$0xf] }
 0x3ef   :  { %v2638_v14 = vld [vmem:[%s3749_s11 + $0x5c] sm:$0xf0] }
 0x3f0   :  { %v715_v38 = vmul.f32 %v702_v31, %v3011_v9  ;;  %1375 = vmatpush.bf16.msrb.mxu1 %v2410_v17  ;;  %v2242_v17 = vor.u32 %v2642_v6, %v2239_v7  ;;  %v2677_v7 = vld [vmem:[%s3749_s11 + $0x19c] sm:$0xf] }
 0x3f5   :  { %v703_v23 = vpop.f32.mrf.mxu2 }
 0x3f6   :  { %v704_v29 = vadd.f32 %v703_v23, %v657_v58 }
 0x3f8   :  { %v716_v35 = vmul.f32 %v704_v29, %v3019_v13  ;;  %v2619_v13 = vld [vmem:[%s3747_s8 + $0x18] sm:$0xff]  ;;  %v2375_v29 = vld [vmem:[%s3749_s11 + $0x1a8] sm:$0xf0] }
 0x3fa   :  { %v757_v41 = vpack.c.bf16 %v716_v35, %v715_v38  ;;  %v2671_v38 = vld [vmem:[%s3749_s11 + $0x164] sm:$0xf0] }
 0x3fb   :  { %v2342_v40 = vor.u32 %v2671_v38, %v2341_v37  ;;  %v2626_v37 = vld [vmem:[%s3749_s11 + $0x4] sm:$0xf] }
 0x3fc   :  { %v2175_v38 = vld [vmem:[%s3749_s11 + $0x20] sm:$0xf0] }
 0x3fd   :  { %v706_v25 = vpop.f32.mrf.mxu2 }
 0x3fe   :  { %v707_v27 = vadd.f32 %v706_v25, %v657_v58  ;;  %v2674_v25 = vld [vmem:[%s3749_s11 + $0x184] sm:$0xf] }
 0x3ff   :  { %v2799_v47 = vpop.permute.xlu1 %2798 }
 0x400   :  { %v717_v32 = vmul.f32 %v707_v27, %v3035_v20  ;;  %v712_v20 = vmul.f32 %v694_v39, %v2987_v56  ;;  %v2616_v56 = vld [vmem:[%s3747_s8] sm:$0xff]  ;;  %v2801_v49 = vunpack.i.h.bf16 %v2799_v47  ;;  %v2373_v27 = vld [vmem:[%s3749_s11 + $0x188] sm:$0xf] }
 0x402   :  { %v790_v55 = vsel %vm389_vm2, %v3162_v48, %v2801_v49  ;;  %v2650_v49 = vld [vmem:[%s3749_s11 + $0xc4] sm:$0xf] }
 0x405   :  { %v708_v28 = vpop.f32.mrf.mxu2 }
 0x406   :  { %v709_v30 = vadd.f32 %v708_v28, %v657_v58  ;;  %v2621_v58 = vld [vmem:[%s3748_s9 + $0x8] sm:$0xff] }
 0x407   :  { %872 = vmatpush.bf16.msra.mxu0 %v2621_v58  ;;  %v2675_v28 = vld [vmem:[%s3749_s11 + $0x18c] sm:$0xf] }
 0x408   :  { %v718_v33 = vmul.f32 %v709_v30, %v3044_v24  ;;  %v711_v24 = vmul.f32 %v692_v42, %v2985_v54  ;;  %v2617_v54 = vld [vmem:[%s3747_s8 + $0x8] sm:$0xff]  ;;  %v2378_v31 = vor.u32 %v2675_v28, %v2375_v29 }
 0x409   :  { %v2343_v42 = vld [vmem:[%s3749_s11 + $0x168] sm:$0xf0]  ;;  %v2181_v29 = vld [vmem:[%s3749_s11 + $0x8] sm:$0xf] }
 0x40a   :  { %v758_v36 = vpack.c.bf16 %v718_v33, %v717_v32  ;;  %v755_v9 = vpack.c.bf16 %v712_v20, %v711_v24  ;;  %v2301_v32 = vld [vmem:[%s3749_s11 + $0x100] sm:$0xf]  ;;  %1376 = vmatpush.bf16.msrb.mxu1 %v2378_v31  ;;  %v2659_v24 = vld [vmem:[%s3749_s11 + $0x10c] sm:$0xf] }
 0x40b   :  { %873 = vmatpush.bf16.msra.mxu0 %v2620_v5  ;;  %v2662_v33 = vld [vmem:[%s3749_s11 + $0x11c] sm:$0xf0]  ;;  %v2651_v58 = vld [vmem:[%s3749_s11 + $0xcc] sm:$0xf]  ;;  %v2238_v5 = vor.u32 %v2646_v3, %v2237_v63  ;;  %v2383_v63 = vld [vmem:[%s3749_s11 + $0x1b0] sm:$0xf0] }
 0x40c   :  { %763 = vmatpush.bf16.msra.mxu3 %v758_v36  ;;  %v2302_v35 = vor.u32 %v2662_v33, %v2301_v32  ;;  %v2335_v36 = vld [vmem:[%s3749_s11 + $0x160] sm:$0xf0]  ;;  %v2282_v4 = vor.u32 %v2651_v58, %v2279_v62  ;;  %v2627_v31 = vld [vmem:[%s3749_s11 + $0xc] sm:$0xf]  ;;  %v2381_v58 = vld [vmem:[%s3749_s11 + $0x190] sm:$0xf] }
 0x40d   :  { %v2338_v39 = vor.u32 %v2666_v34, %v2335_v36  ;;  %v2183_v33 = vld [vmem:[%s3749_s11 + $0x28] sm:$0xf0]  ;;  %v2413_v34 = vld [vmem:[%s3749_s11 + $0x1d0] sm:$0xf]  ;;  %v2389_v3 = vld [vmem:[%s3749_s11 + $0x198] sm:$0xf] }
 0x40e   :  { %1336 = vmatpush.bf16.msra.mxu2 %v2302_v35  ;;  %v2688_v35 = vld [vmem:[%s3749_s11 + $0x1ec] sm:$0xf0] }
 0x40f   :  { %1361 = vmatpush.bf16.msrb.mxu0 %v2406_v1  ;;  %v2250_v1 = vor.u32 %v2643_v10, %v2247_v50  ;;  %v2672_v50 = vld [vmem:[%s3749_s11 + $0x16c] sm:$0xf0] }
 0x410   :  { %764 = vmatpush.bf16.msra.mxu3 %v757_v41  ;;  %v2667_v41 = vld [vmem:[%s3749_s11 + $0x14c] sm:$0xf] }
 0x411   :  { %v2346_v20 = vor.u32 %v2667_v41, %v2343_v42  ;;  %v2414_v41 = vor.u32 %v2688_v35, %v2413_v34  ;;  %v2415_v42 = vld [vmem:[%s3749_s11 + $0x1f0] sm:$0xf0]  ;;  %v2285_v35 = vld [vmem:[%s3749_s11 + $0xd0] sm:$0xf] }
 0x413   :  { %1377 = vmatpush.bf16.msrb.mxu1 %v2346_v20  ;;  %v2423_v20 = vld [vmem:[%s3749_s11 + $0x1f8] sm:$0xf0] }
 0x414   :  { %765 = vmatpush.bf16.msra.mxu3 %v756_v44  ;;  %v2663_v44 = vld [vmem:[%s3749_s11 + $0x124] sm:$0xf0] }
 0x418   :  { %766 = vmatpush.bf16.msra.mxu3 %v755_v9  ;;  %v2310_v9 = vor.u32 %v2663_v44, %v2309_v43  ;;  %v2685_v43 = vld [vmem:[%s3749_s11 + $0x1dc] sm:$0xf]  ;;  %v2186_v44 = vor.u32 %v2627_v31, %v2183_v33 }
 0x419   :  { %v2327_v33 = vld [vmem:[%s3749_s11 + $0x138] sm:$0xf0] }
 0x41b   :  { %2127 = vmatmul.msk.bf16.vlgmr.msra.gmra.mxu3 %vm243_vm1, %v3107_v52  ;;  %v2800_v52 = vunpack.i.l.bf16 %v2799_v47  ;;  %v2654_v47 = vld [vmem:[%s3749_s11 + $0xdc] sm:$0xf0] }
 0x41c   :  { %834 = vmatpush.bf16.msrb.mxu3 %v2619_v13  ;;  %v2311_v13 = vld [vmem:[%s3749_s11 + $0x128] sm:$0xf0] }
 0x41d   :  { %v789_v53 = vsel %vm389_vm2, %v3160_v46, %v2800_v52  ;;  %v2271_v52 = vld [vmem:[%s3749_s11 + $0xe0] sm:$0xf0] }
 0x41e   :  { %v791_v57 = vpack.c.bf16 %v790_v55, %v789_v53  ;;  %v2270_v53 = vor.u32 %v2654_v47, %v2269_v61  ;;  %v2277_v55 = vld [vmem:[%s3749_s11 + $0xc8] sm:$0xf]  ;;  %v2274_v59 = vor.u32 %v2650_v49, %v2271_v52  ;;  %v2421_v49 = vld [vmem:[%s3749_s11 + $0x1d8] sm:$0xf] }
 0x41f   :  { %v2689_v52 = vld [vmem:[%s3749_s11 + $0x1f4] sm:$0xf0] }
 0x420   :  { %835 = vmatpush.bf16.msrb.mxu3 %v2618_v2  ;;  %v2314_v2 = vor.u32 %v2659_v24, %v2311_v13  ;;  %1337 = vmatpush.bf16.msra.mxu2 %v2270_v53  ;;  %v2178_v24 = vor.u32 %v2626_v37, %v2175_v38  ;;  %v2426_v13 = vor.u32 %v2685_v43, %v2423_v20  ;;  %v2652_v37 = vld [vmem:[%s3749_s11 + $0xd4] sm:$0xf]  ;;  %v2653_v20 = vld [vmem:[%s3749_s11 + $0xdc] sm:$0xf] }
 0x422   :  { %1378 = vmatpush.bf16.msrb.mxu1 %v2314_v2 }
 0x424   :  { %836 = vmatpush.bf16.msrb.mxu3 %v2617_v54  ;;  %v2658_v54 = vld [vmem:[%s3749_s11 + $0x104] sm:$0xf]  ;;  %1338 = vmatpush.bf16.msra.mxu2 %v2238_v5 }
 0x426   :  { %1379 = vmatpush.bf16.msrb.mxu1 %v2282_v4  ;;  %v2681_v4 = vld [vmem:[%s3749_s11 + $0x1b4] sm:$0xf0] }
 0x427   :  { %v2390_v6 = vor.u32 %v2681_v4, %v2389_v3  ;;  %v2641_v3 = vld [vmem:[%s3749_s11 + $0x74] sm:$0xf0]  ;;  %v2637_v4 = vld [vmem:[%s3749_s11 + $0x5c] sm:$0xf] }
 0x428   :  { %837 = vmatpush.bf16.msrb.mxu3 %v2616_v56  ;;  %v2303_v56 = vld [vmem:[%s3749_s11 + $0x120] sm:$0xf0] }
 0x429   :  { %v2306_v45 = vor.u32 %v2658_v54, %v2303_v56  ;;  %v825_v54 = vpop.permute.xlu2 %824 }
 0x42a   :  { %1380 = vmatpush.bf16.msrb.mxu1 %v2250_v1  ;;  %v2351_v1 = vld [vmem:[%s3749_s11 + $0x170] sm:$0xf0] }
 0x42b   :  { %2144 = vmatmul.msk.bf16.vlgmr.msrb.gmra.mxu3 %vm243_vm1, %v791_v57  ;;  %v2655_v57 = vld [vmem:[%s3749_s11 + $0xe4] sm:$0xf0] }
 0x42c   :  { %1347 = vmatpush.bf16.msra.mxu3 %v2402_v11  ;;  %v2278_v60 = vor.u32 %v2655_v57, %v2277_v55  ;;  %v2246_v11 = vor.u32 %v2647_v8, %v2245_v0  ;;  %v2422_v55 = vor.u32 %v2689_v52, %v2421_v49  ;;  %v2391_v0 = vld [vmem:[%s3749_s11 + $0x1b8] sm:$0xf0]  ;;  %v2349_v8 = vld [vmem:[%s3749_s11 + $0x150] sm:$0xf] }
 0x42d   :  { %v2394_v10 = vor.u32 %v2677_v7, %v2391_v0  ;;  %v2645_v49 = vld [vmem:[%s3749_s11 + $0x9c] sm:$0xf]  ;;  %v2189_v0 = vld [vmem:[%s3749_s11 + $0x10] sm:$0xf] }
 0x49e   :  { %v768_v19 = vpop.f32.mrf.mxu3 }
 0x49f   :  { %v773_v22 = vmul.f32 %v768_v19, %v3122_v16  ;;  %v2370_v16 = vor.u32 %v2674_v25, %v2367_v26  ;;  %v2213_v19 = vld [vmem:[%s3749_s11 + $0x48] sm:$0xf]  ;;  %v2635_v25 = vld [vmem:[%s3749_s11 + $0x4c] sm:$0xf] }
 0x4a0   :  { %v2215_v26 = vld [vmem:[%s3749_s11 + $0x68] sm:$0xf0] }
 0x4a1   :  { %1348 = vmatpush.bf16.msra.mxu3 %v2370_v16  ;;  %v2173_v16 = vld [vmem:[%s3749_s11] sm:$0xf]  ;;  %v2218_v28 = vor.u32 %v2635_v25, %v2215_v26  ;;  %v2317_v25 = vld [vmem:[%s3749_s11 + $0x110] sm:$0xf] }
 0x4a2   :  { %v2664_v26 = vld [vmem:[%s3749_s11 + $0x12c] sm:$0xf0] }
 0x4a3   :  { %1381 = vmatpush.bf16.msrb.mxu1 %v2218_v28  ;;  %v2325_v28 = vld [vmem:[%s3749_s11 + $0x118] sm:$0xf] }
 0x4a5   :  { %1349 = vmatpush.bf16.msra.mxu3 %v2338_v39  ;;  %v2684_v39 = vld [vmem:[%s3749_s11 + $0x1d4] sm:$0xf] }
 0x4a6   :  { %v770_v21 = vpop.f32.mrf.mxu3 }
 0x4a7   :  { %v774_v23 = vmul.f32 %v770_v21, %v3120_v15  ;;  %v2679_v15 = vld [vmem:[%s3749_s11 + $0x1a4] sm:$0xf0]  ;;  %1382 = vmatpush.bf16.msrb.mxu1 %v2186_v44  ;;  %v2295_v44 = vld [vmem:[%s3749_s11 + $0xf8] sm:$0xf0] }
 0x4a8   :  { %v2374_v30 = vor.u32 %v2679_v15, %v2373_v27  ;;  %v2639_v21 = vld [vmem:[%s3749_s11 + $0x64] sm:$0xf0]  ;;  %v2630_v15 = vld [vmem:[%s3749_s11 + $0x1c] sm:$0xf0] }
 0x4a9   :  { %v3213_v51 = vpack.c.bf16 %v774_v23, %v773_v22  ;;  %1350 = vmatpush.bf16.msra.mxu3 %v2306_v45  ;;  %v2206_v22 = vor.u32 %v2638_v14, %v2205_v12  ;;  %v2207_v23 = vld [vmem:[%s3749_s11 + $0x60] sm:$0xf0]  ;;  %v2214_v27 = vor.u32 %v2639_v21, %v2213_v19  ;;  %v2174_v36 = vor.u32 %v2630_v15, %v2173_v16  ;;  %v2669_v19 = vld [vmem:[%s3749_s11 + $0x15c] sm:$0xf]  ;;  %v2319_v15 = vld [vmem:[%s3749_s11 + $0x130] sm:$0xf0] }
 0x4aa   :  { %1362 = vmatpush.bf16.msrb.mxu0 %v2374_v30  ;;  %v2631_v30 = vld [vmem:[%s3749_s11 + $0x24] sm:$0xf0]  ;;  %v2210_v32 = vor.u32 %v2634_v18, %v2207_v23  ;;  %v2350_v12 = vor.u32 %v2672_v50, %v2349_v8  ;;  %v2673_v18 = vld [vmem:[%s3749_s11 + $0x174] sm:$0xf0]  ;;  %v2318_v16 = vor.u32 %v2664_v26, %v2317_v25  ;;  %v2632_v8 = vld [vmem:[%s3749_s11 + $0x2c] sm:$0xf0] }
 0x4ab   :  { %2170 = vmatmul.msk.bf16.vlgmr.msra.gmra.mxu1 %vm243_vm1, %v3213_v51  ;;  %1339 = vmatpush.bf16.msra.mxu2 %v2206_v22  ;;  %v2359_v22 = vld [vmem:[%s3749_s11 + $0x178] sm:$0xf0]  ;;  %v3569_v25 = vld [vmem:[%s3740_s15] sm:$0xff] }
 0x4ac   :  { %1431 = vmatpush.bf16.msra.mxu1 %v2426_v13  ;;  %v2362_v23 = vor.u32 %v2669_v19, %v2359_v22  ;;  %v2298_v13 = vor.u32 %v2653_v20, %v2295_v44  ;;  %v906_v26 = vperm.slane %v3569_v25, 4  ;;  %v2695_v20 = vld [vmem:[%s3751_s12 + $0x28] sm:$0xff] }
 0x4ad   :  { %1351 = vmatpush.bf16.msra.mxu3 %v2274_v59  ;;  %v2680_v59 = vld [vmem:[%s3749_s11 + $0x1ac] sm:$0xf0]  ;;  %v2703_v44 = vld [vmem:[%s3751_s12 + $0x68] sm:$0xff] }
 0x4ae   :  { %1363 = vmatpush.bf16.msrb.mxu0 %v2342_v40  ;;  %v2182_v40 = vor.u32 %v2631_v30, %v2181_v29  ;;  %v839_v2 = vpop.f32.mrf.mxu3  ;;  %v2382_v62 = vor.u32 %v2680_v59, %v2381_v58  ;;  %v2665_v29 = vld [vmem:[%s3749_s11 + $0x134] sm:$0xf0]  ;;  %v2636_v59 = vld [vmem:[%s3749_s11 + $0x54] sm:$0xf] }
 0x4af   :  { %1340 = vmatpush.bf16.msra.mxu2 %v2174_v36  ;;  %v840_v56 = vadd.f32 %v839_v2, %v825_v54  ;;  %v2326_v31 = vor.u32 %v2665_v29, %v2325_v28  ;;  %v2656_v36 = vld [vmem:[%s3749_s11 + $0xec] sm:$0xf0]  ;;  %v2644_v2 = vld [vmem:[%s3749_s11 + $0x94] sm:$0xf]  ;;  %v2725_v29 = vld [vmem:[%s3750_s13 + $0x18] sm:$0xff] }
 0x4b0   :  { %1432 = vmatpush.bf16.msra.mxu1 %v2394_v10  ;;  %v2286_v38 = vor.u32 %v2656_v36, %v2285_v35  ;;  %v2628_v10 = vld [vmem:[%s3749_s11 + $0x14] sm:$0xf] }
 0x4b1   :  { %1352 = vmatpush.bf16.msra.mxu3 %v2242_v17  ;;  %v844_v45 = vmax.f32 %v840_v56, 0.0  ;;  %v2357_v17 = vld [vmem:[%s3749_s11 + $0x158] sm:$0xf]  ;;  %v2712_v35 = vld [vmem:[%s3751_s12 + $0xb0] sm:$0xff] }
 0x4b2   :  { %1364 = vmatpush.bf16.msrb.mxu0 %v2310_v9  ;;  %v2418_v9 = vor.u32 %v2684_v39, %v2415_v42  ;;  %v2358_v21 = vor.u32 %v2673_v18, %v2357_v17  ;;  %v2287_v39 = vld [vmem:[%s3749_s11 + $0xf0] sm:$0xf0]  ;;  %v2199_v17 = vld [vmem:[%s3749_s11 + $0x38] sm:$0xf0]  ;;  %v2190_v18 = vor.u32 %v2632_v8, %v2189_v0 }
 0x4b3   :  { %1389 = vmatpush.bf16.msrb.mxu2 %v2414_v41  ;;  %v2657_v41 = vld [vmem:[%s3749_s11 + $0xf4] sm:$0xf0]  ;;  %v2290_v42 = vor.u32 %v2652_v37, %v2287_v39  ;;  %v2720_v36 = vld [vmem:[%s3751_s12 + $0xf0] sm:$0xff]  ;;  %v2719_v39 = vld [vmem:[%s3751_s12 + $0xe8] sm:$0xff] }
 0x4b4   :  { %1433 = vmatpush.bf16.msra.mxu1 %v2362_v23  ;;  %v2705_v37 = vld [vmem:[%s3751_s12 + $0x78] sm:$0xff] }
 0x4b5   :  { %1353 = vmatpush.bf16.msra.mxu3 %v2210_v32  ;;  %v2661_v32 = vld [vmem:[%s3749_s11 + $0x11c] sm:$0xf] }
 0x4b6   :  { %1365 = vmatpush.bf16.msrb.mxu0 %v2278_v60  ;;  %v841_v61 = vpop.f32.mrf.mxu3  ;;  %v2676_v60 = vld [vmem:[%s3749_s11 + $0x194] sm:$0xf]  ;;  %v2330_v34 = vor.u32 %v2661_v32, %v2327_v33  ;;  %v2722_v32 = vld [vmem:[%s3750_s13] sm:$0xff]  ;;  %v2713_v33 = vld [vmem:[%s3751_s12 + $0xb8] sm:$0xff] }
 0x4b7   :  { %v842_v47 = vadd.f32 %v841_v61, %v825_v54  ;;  %v2386_v5 = vor.u32 %v2676_v60, %v2383_v63  ;;  %1390 = vmatpush.bf16.msrb.mxu2 %v2382_v62  ;;  %v2255_v54 = vld [vmem:[%s3749_s11 + $0xb0] sm:$0xf0]  ;;  %v2229_v62 = vld [vmem:[%s3749_s11 + $0x58] sm:$0xf] }
 0x4b8   :  { %1434 = vmatpush.bf16.msra.mxu1 %v2330_v34  ;;  %v2258_v61 = vor.u32 %v2644_v2, %v2255_v54  ;;  %v2223_v60 = vld [vmem:[%s3749_s11 + $0x70] sm:$0xf0]  ;;  %v2230_v7 = vor.u32 %v2641_v3, %v2229_v62  ;;  %v2721_v34 = vld [vmem:[%s3751_s12 + $0xf8] sm:$0xff]  ;;  %v2694_v2 = vld [vmem:[%s3751_s12 + $0x20] sm:$0xff] }
 0x4b9   :  { %1354 = vmatpush.bf16.msra.mxu3 %v2178_v24  ;;  %v845_v53 = vmax.f32 %v842_v47, 0.0  ;;  %v2253_v24 = vld [vmem:[%s3749_s11 + $0x90] sm:$0xf]  ;;  %v2649_v47 = vld [vmem:[%s3749_s11 + $0xb4] sm:$0xf0]  ;;  %v2702_v54 = vld [vmem:[%s3751_s12 + $0x60] sm:$0xff] }
 0x4ba   :  { %1366 = vmatpush.bf16.msrb.mxu0 %v2246_v11  ;;  %v2668_v11 = vld [vmem:[%s3749_s11 + $0x154] sm:$0xf]  ;;  %v2699_v62 = vld [vmem:[%s3751_s12 + $0x48] sm:$0xff]  ;;  %v2698_v3 = vld [vmem:[%s3751_s12 + $0x40] sm:$0xff] }
 0x4bb   :  { %v846_v57 = vpack.c.bf16 %v845_v53, %v844_v45  ;;  %v2354_v14 = vor.u32 %v2668_v11, %v2351_v1  ;;  %1391 = vmatpush.bf16.msrb.mxu2 %v2350_v12  ;;  %v2261_v45 = vld [vmem:[%s3749_s11 + $0x98] sm:$0xf]  ;;  %v2263_v53 = vld [vmem:[%s3749_s11 + $0xb8] sm:$0xf0]  ;;  %v2191_v11 = vld [vmem:[%s3749_s11 + $0x30] sm:$0xf0] }
 0x4bc   :  { %1435 = vmatpush.bf16.msra.mxu1 %v2298_v13  ;;  %v2262_v52 = vor.u32 %v2649_v47, %v2261_v45  ;;  %v2266_v58 = vor.u32 %v2645_v49, %v2263_v53  ;;  %v2197_v1 = vld [vmem:[%s3749_s11 + $0x18] sm:$0xf]  ;;  %v2194_v19 = vor.u32 %v2628_v10, %v2191_v11  ;;  %v2707_v49 = vld [vmem:[%s3751_s12 + $0x88] sm:$0xff]  ;;  %v2692_v53 = vld [vmem:[%s3751_s12 + $0x10] sm:$0xff] }
 0x4bd   :  { %1403 = vmatpush.bf16.msrb.mxu3 %v2418_v9  ;;  %2153 = vmatmul.msk.bf16.vlgmr.msra.gmra.mxu0 %vm389_vm2, %v846_v57  ;;  %v2648_v9 = vld [vmem:[%s3749_s11 + $0xac] sm:$0xf0]  ;;  %v2633_v12 = vld [vmem:[%s3749_s11 + $0x34] sm:$0xf0] }
 0x4be   :  { %1367 = vmatpush.bf16.msrb.mxu0 %v2214_v27  ;;  %v2660_v27 = vld [vmem:[%s3749_s11 + $0x114] sm:$0xf]  ;;  %v2254_v56 = vor.u32 %v2648_v9, %v2253_v24  ;;  %v2640_v57 = vld [vmem:[%s3749_s11 + $0x6c] sm:$0xf0]  ;;  %v2709_v24 = vld [vmem:[%s3751_s12 + $0x98] sm:$0xff] }
 0x4bf   :  { %v2322_v30 = vor.u32 %v2660_v27, %v2319_v15  ;;  %1392 = vmatpush.bf16.msrb.mxu2 %v2318_v16  ;;  %v2717_v13 = vld [vmem:[%s3751_s12 + $0xd8] sm:$0xff] }
 0x4c0   :  { %1436 = vmatpush.bf16.msra.mxu1 %v2266_v58  ;;  %v2693_v45 = vld [vmem:[%s3751_s12 + $0x18] sm:$0xff]  ;;  %v2706_v58 = vld [vmem:[%s3751_s12 + $0x80] sm:$0xff] }
 0x4c1   :  { %1404 = vmatpush.bf16.msrb.mxu3 %v2386_v5  ;;  %v2231_v5 = vld [vmem:[%s3749_s11 + $0x78] sm:$0xf0] }
 0x4c2   :  { %1368 = vmatpush.bf16.msrb.mxu0 %v2182_v40  ;;  %v2293_v40 = vld [vmem:[%s3749_s11 + $0xd8] sm:$0xf]  ;;  %v2234_v50 = vor.u32 %v2637_v4, %v2231_v5 }
 0x4c3   :  { %v2294_v43 = vor.u32 %v2657_v41, %v2293_v40  ;;  %1393 = vmatpush.bf16.msrb.mxu2 %v2286_v38  ;;  %v2711_v38 = vld [vmem:[%s3751_s12 + $0xa8] sm:$0xff]  ;;  %v2696_v40 = vld [vmem:[%s3751_s12 + $0x30] sm:$0xff]  ;;  %v2701_v47 = vld [vmem:[%s3751_s12 + $0x58] sm:$0xff] }
 0x4c4   :  { %1437 = vmatpush.bf16.msra.mxu1 %v2234_v50  ;;  %v2704_v41 = vld [vmem:[%s3751_s12 + $0x70] sm:$0xff] }
 0x4c5   :  { %1405 = vmatpush.bf16.msrb.mxu3 %v2354_v14  ;;  %v2629_v14 = vld [vmem:[%s3749_s11 + $0x1c] sm:$0xf] }
 0x4c6   :  { %1417 = vmatpush.bf16.msra.mxu0 %v2422_v55  ;;  %v2221_v55 = vld [vmem:[%s3749_s11 + $0x50] sm:$0xf]  ;;  %v2202_v22 = vor.u32 %v2629_v14, %v2199_v17 }
 0x4c7   :  { %1394 = vmatpush.bf16.msrb.mxu2 %v2254_v56  ;;  %v2222_v63 = vor.u32 %v2640_v57, %v2221_v55  ;;  %v2708_v56 = vld [vmem:[%s3751_s12 + $0x90] sm:$0xff] }
 0x4c8   :  { %1438 = vmatpush.bf16.msra.mxu1 %v2202_v22  ;;  %v2700_v55 = vld [vmem:[%s3751_s12 + $0x50] sm:$0xff] }
 0x4c9   :  { %1406 = vmatpush.bf16.msrb.mxu3 %v2322_v30  ;;  %v2724_v30 = vld [vmem:[%s3750_s13 + $0x10] sm:$0xff] }
 0x4ca   :  { %1418 = vmatpush.bf16.msra.mxu0 %v2390_v6  ;;  %v2226_v6 = vor.u32 %v2636_v59, %v2223_v60  ;;  %v2714_v59 = vld [vmem:[%s3751_s12 + $0xc0] sm:$0xff]  ;;  %v2691_v60 = vld [vmem:[%s3751_s12 + $0x8] sm:$0xff] }
 0x4cb   :  { %1395 = vmatpush.bf16.msrb.mxu2 %v2222_v63  ;;  %v2690_v63 = vld [vmem:[%s3751_s12] sm:$0xff] }
 0x4cd   :  { %1407 = vmatpush.bf16.msrb.mxu3 %v2290_v42  ;;  %v2710_v42 = vld [vmem:[%s3751_s12 + $0xa0] sm:$0xff] }
 0x4ce   :  { %1419 = vmatpush.bf16.msra.mxu0 %v2358_v21  ;;  %v2198_v21 = vor.u32 %v2633_v12, %v2197_v1 }
 0x4cf   :  { %1396 = vmatpush.bf16.msrb.mxu2 %v2190_v18 }
 0x4d1   :  { %1408 = vmatpush.bf16.msrb.mxu3 %v2258_v61  ;;  %v2716_v61 = vld [vmem:[%s3751_s12 + $0xd0] sm:$0xff] }
 0x4d2   :  { %1420 = vmatpush.bf16.msra.mxu0 %v2326_v31  ;;  %v2723_v31 = vld [vmem:[%s3750_s13 + $0x8] sm:$0xff] }
 0x4d5   :  { %1409 = vmatpush.bf16.msrb.mxu3 %v2226_v6 }
 0x4d6   :  { %1421 = vmatpush.bf16.msra.mxu0 %v2294_v43  ;;  %v2718_v43 = vld [vmem:[%s3751_s12 + $0xe0] sm:$0xff] }
 0x4d9   :  { %1410 = vmatpush.bf16.msrb.mxu3 %v2194_v19 }
 0x4da   :  { %1422 = vmatpush.bf16.msra.mxu0 %v2262_v52  ;;  %v2715_v52 = vld [vmem:[%s3751_s12 + $0xc8] sm:$0xff] }
 0x4de   :  { %1423 = vmatpush.bf16.msra.mxu0 %v2230_v7 }
 0x4e2   :  { %1424 = vmatpush.bf16.msra.mxu0 %v2198_v21 }
 0x528   :  { %v943_v23 = vpop.f32.mrf.mxu1 }
 0x529   :  { %v944_v16 = vadd.f32 %v943_v23, %v906_v26 }
 0x530   :  { %v945_v27 = vpop.f32.mrf.mxu1 }
 0x531   :  { %v946_v15 = vadd.f32 %v945_v27, %v906_v26 }
 0x533   :  { %v948_v28 = vpack.c.bf16 %v946_v15, %v944_v16 }
 0x535   :  { %1341 = vmatmul.bf16.vlgmr.msra.gmra.mxu2 %v948_v28  ;;  %1355 = vmatmul.bf16.vlgmr.msra.gmra.mxu3 %v948_v28 }
 0x536   :  { %1369 = vmatmul.bf16.vlgmr.msrb.gmra.mxu0 %v948_v28  ;;  %1383 = vmatmul.bf16.vlgmr.msrb.gmra.mxu1 %v948_v28 }
 0x537   :  { %1557 = vmatpush.bf16.msra.mxu2 %v2725_v29  ;;  %1787 = vmatpush.bf16.msrb.mxu0 %v2713_v33 }
 0x538   :  { %1801 = vmatpush.bf16.msrb.mxu1 %v2721_v34  ;;  %1773 = vmatpush.bf16.msra.mxu3 %v2705_v37  ;;  %v2729_v34 = vld [vmem:[%s3752_s14 + $0x18] sm:$0xff]  ;;  %v2726_v37 = vld [vmem:[%s3752_s14] sm:$0xff] }
 0x53a   :  { %v3634_v9 = vpop.f32.mrf.mxu0 }
 0x53b   :  { %1558 = vmatpush.bf16.msra.mxu2 %v2724_v30  ;;  %1788 = vmatpush.bf16.msrb.mxu0 %v2712_v35  ;;  %v2728_v35 = vld [vmem:[%s3752_s14 + $0x10] sm:$0xff] }
 0x53c   :  { %1802 = vmatpush.bf16.msrb.mxu1 %v2720_v36  ;;  %1774 = vmatpush.bf16.msra.mxu3 %v2704_v41 }
 0x53f   :  { %1559 = vmatpush.bf16.msra.mxu2 %v2723_v31  ;;  %1789 = vmatpush.bf16.msrb.mxu0 %v2711_v38 }
 0x540   :  { %1803 = vmatpush.bf16.msrb.mxu1 %v2719_v39  ;;  %1775 = vmatpush.bf16.msra.mxu3 %v2703_v44 }
 0x542   :  { %v3666_v57 = vpop.f32.mrf.mxu0 }
 0x543   :  { %1560 = vmatpush.bf16.msra.mxu2 %v2722_v32  ;;  %1790 = vmatpush.bf16.msrb.mxu0 %v2710_v42 }
 0x544   :  { %1804 = vmatpush.bf16.msrb.mxu1 %v2718_v43  ;;  %1776 = vmatpush.bf16.msra.mxu3 %v2702_v54 }
 0x545   :  { %1397 = vmatmul.bf16.vlgmr.msrb.gmra.mxu2 %v948_v28  ;;  %1411 = vmatmul.bf16.vlgmr.msrb.gmra.mxu3 %v948_v28 }
 0x546   :  { %1425 = vmatmul.bf16.vlgmr.msra.gmra.mxu0 %v948_v28  ;;  %1439 = vmatmul.bf16.vlgmr.msra.gmra.mxu1 %v948_v28 }
 0x547   :  { %1791 = vmatpush.bf16.msrb.mxu0 %v2709_v24  ;;  %v1817_v24 = vpop.permute.xlu0 %1816 }
 0x548   :  { %1805 = vmatpush.bf16.msrb.mxu1 %v2717_v13  ;;  %1777 = vmatpush.bf16.msra.mxu3 %v2701_v47 }
 0x54b   :  { %1792 = vmatpush.bf16.msrb.mxu0 %v2708_v56 }
 0x54c   :  { %1806 = vmatpush.bf16.msrb.mxu1 %v2716_v61  ;;  %1778 = vmatpush.bf16.msra.mxu3 %v2700_v55 }
 0x54f   :  { %1793 = vmatpush.bf16.msrb.mxu0 %v2707_v49 }
 0x550   :  { %1807 = vmatpush.bf16.msrb.mxu1 %v2715_v52  ;;  %1779 = vmatpush.bf16.msra.mxu3 %v2699_v62  ;;  %v3706_v62 = vperm.slane %v3569_v25, 3 }
 0x553   :  { %1794 = vmatpush.bf16.msrb.mxu0 %v2706_v58 }
 0x554   :  { %1808 = vmatpush.bf16.msrb.mxu1 %v2714_v59  ;;  %1780 = vmatpush.bf16.msra.mxu3 %v2698_v3 }
 0x555   :  { %2443 = vmatmul.msk.bf16.vlgmr.msra.gmra.mxu2 %vm243_vm1, %v3213_v51  ;;  %v2697_v51 = vld [vmem:[%s3751_s12 + $0x38] sm:$0xff] }
 0x556   :  { %1759 = vmatpush.bf16.msrb.mxu2 %v2697_v51  ;;  %v2727_v51 = vld [vmem:[%s3752_s14 + $0x8] sm:$0xff] }
 0x55a   :  { %1760 = vmatpush.bf16.msrb.mxu2 %v2696_v40 }
 0x55e   :  { %1761 = vmatpush.bf16.msrb.mxu2 %v2695_v20 }
 0x562   :  { %1762 = vmatpush.bf16.msrb.mxu2 %v2694_v2 }
 0x566   :  { %1763 = vmatpush.bf16.msrb.mxu2 %v2693_v45 }
 0x56a   :  { %1764 = vmatpush.bf16.msrb.mxu2 %v2692_v53 }
 0x56e   :  { %1765 = vmatpush.bf16.msrb.mxu2 %v2691_v60 }
 0x572   :  { %1766 = vmatpush.bf16.msrb.mxu2 %v2690_v63 }
 0x576   :  { %1863 = vmatpush.bf16.msra.mxu2 %v2729_v34 }
 0x57a   :  { %1864 = vmatpush.bf16.msra.mxu2 %v2728_v35 }
 0x57e   :  { %1865 = vmatpush.bf16.msra.mxu2 %v2727_v51 }
 0x582   :  { %1866 = vmatpush.bf16.msra.mxu2 %v2726_v37 }
 0x5b3   :  { %v1370_v4 = vpop.f32.mrf.mxu0  ;;  %v1384_v5 = vpop.f32.mrf.mxu1 }
 0x5b8   :  { %v1342_v6 = vpop.f32.mrf.mxu2  ;;  %v1356_v7 = vpop.f32.mrf.mxu3 }
 0x5bb   :  { %v1372_v0 = vpop.f32.mrf.mxu0  ;;  %v1386_v8 = vpop.f32.mrf.mxu1 }
 0x5c0   :  { %v1344_v10 = vpop.f32.mrf.mxu2  ;;  %v1358_v50 = vpop.f32.mrf.mxu3 }
 0x5c3   :  { %v1426_v11 = vpop.f32.mrf.mxu0  ;;  %v1440_v1 = vpop.f32.mrf.mxu1 }
 0x5c4   :  { %v1447_v19 = vmul.f32 %v1426_v11, %v1370_v4  ;;  %v1448_v21 = vmul.f32 %v1440_v1, %v1384_v5 }
 0x5c8   :  { %v1398_v12 = vpop.f32.mrf.mxu2  ;;  %v1412_v14 = vpop.f32.mrf.mxu3 }
 0x5c9   :  { %v1445_v28 = vmul.f32 %v1398_v12, %v1342_v6  ;;  %v1446_v29 = vmul.f32 %v1412_v14, %v1356_v7 }
 0x5cb   :  { %v1428_v17 = vpop.f32.mrf.mxu0  ;;  %v1442_v18 = vpop.f32.mrf.mxu1 }
 0x5cc   :  { %v1451_v22 = vmul.f32 %v1428_v17, %v1372_v0  ;;  %v1452_v23 = vmul.f32 %v1442_v18, %v1386_v8 }
 0x5ce   :  { %v1455_v26 = vpack.c.bf16 %v1451_v22, %v1447_v19  ;;  %v1456_v27 = vpack.c.bf16 %v1452_v23, %v1448_v21 }
 0x5d0   :  { %1795 = vmatmul.bf16.vlgmr.msrb.gmra.mxu0 %v1455_v26  ;;  %1809 = vmatmul.bf16.vlgmr.msrb.gmra.mxu1 %v1456_v27  ;;  %v1400_v16 = vpop.f32.mrf.mxu2  ;;  %v1414_v15 = vpop.f32.mrf.mxu3 }
 0x5d1   :  { %v1449_v30 = vmul.f32 %v1400_v16, %v1344_v10  ;;  %v1450_v31 = vmul.f32 %v1414_v15, %v1358_v50 }
 0x5d3   :  { %v1453_v32 = vpack.c.bf16 %v1449_v30, %v1445_v28  ;;  %v1454_v33 = vpack.c.bf16 %v1450_v31, %v1446_v29 }
 0x5d5   :  { %1767 = vmatmul.bf16.vlgmr.msrb.gmra.mxu2 %v1453_v32  ;;  %1781 = vmatmul.bf16.vlgmr.msra.gmra.mxu3 %v1454_v33 }
 0x5d8   :  { %v1562_v36 = vpop.f32.mrf.mxu2 }
 0x5e0   :  { %v1564_v38 = vpop.f32.mrf.mxu2 }
 0x64d   :  { %v1796_v42 = vpop.f32.mrf.mxu0  ;;  %v1810_v20 = vpop.f32.mrf.mxu1 }
 0x655   :  { %v1798_v47 = vpop.f32.mrf.mxu0  ;;  %v1812_v52 = vpop.f32.mrf.mxu1 }
 0x658   :  { %v1768_v39 = vpop.f32.mrf.mxu2  ;;  %v1782_v40 = vpop.f32.mrf.mxu3 }
 0x659   :  { %v1769_v41 = vadd.f32 %v1768_v39, %v1562_v36 }
 0x65b   :  { %v1783_v43 = vadd.f32 %v1782_v40, %v1769_v41 }
 0x65d   :  { %v1797_v44 = vadd.f32 %v1796_v42, %v1783_v43 }
 0x65f   :  { %v1811_v13 = vadd.f32 %v1810_v20, %v1797_v44 }
 0x660   :  { %v1770_v2 = vpop.f32.mrf.mxu2  ;;  %v1784_v61 = vpop.f32.mrf.mxu3 }
 0x661   :  { %v1819_v54 = vadd.f32 %v1817_v24, %v1811_v13  ;;  %v1771_v56 = vadd.f32 %v1770_v2, %v1564_v38 }
 0x663   :  { %v1785_v45 = vadd.f32 %v1784_v61, %v1771_v56  ;;  %1945 = vrot.lane.b32.xlu0 %v1819_v54, %s2819_s1  ;;  %v1821_v58 = vmul.f32 %v1819_v54, %v1819_v54 }
 0x665   :  { %v1799_v49 = vadd.f32 %v1798_v47, %v1785_v45  ;;  %v2817_v47 = vld [vmem:[%s3756_s23 + $0x8] sm:$0xff] }
 0x667   :  { %v1813_v53 = vadd.f32 %v1812_v52, %v1799_v49 }
 0x669   :  { %v1820_v55 = vadd.f32 %v1817_v24, %v1813_v53  ;;  %v2818_v53 = vld [vmem:[%s3756_s23] sm:$0xff] }
 0x66b   :  { %v1822_v59 = vmul.f32 %v1820_v55, %v1820_v55  ;;  %1947 = vrot.lane.b32.xlu0 %v1820_v55, %s2819_s1 }
 0x66d   :  { %v1823_v60 = vpack.c.bf16 %v1822_v59, %v1821_v58  ;;  %v2823_v59 = vmov 8.0  }
 0x66f   :  { %2588 = vmatmul.msk.bf16.vlgmr.msra.gmra.mxu2 %vm243_vm1, %v1823_v60 }
 0x673   :  { %882 = vrot.lane.b32.xlu0 %v3634_v9, %s2819_s1 }
 0x67b   :  { %884 = vrot.lane.b32.xlu0 %v3666_v57, %s2819_s1 }
 0x683   :  { %892 = vrot.lane.b32.xlu0 %v3706_v62, %s2819_s1 }
 0x6d5   :  { %v3710_v22 = vpop.permute.xlu0 %1945 }
 0x6dd   :  { %v1948_v32 = vpop.permute.xlu0 %1947 }
 0x6e5   :  { %v883_v43 = vpop.permute.xlu0 %882 }
 0x6e6   :  { %v888_v55 = vadd.f32 %v2818_v53, %v883_v43 }
 0x6ed   :  { %v885_v61 = vpop.permute.xlu0 %884 }
 0x6ee   :  { %v889_v49 = vadd.f32 %v2817_v47, %v885_v61 }
 0x6f2   :  { %v1868_v63 = vpop.f32.mrf.mxu2 }
 0x6f3   :  { %v1873_v3 = vmul.f32 %v1868_v63, %v1868_v63 }
 0x6f5   :  { %v1875_v4 = vadd.f32 1e-16, %v1873_v3  ;;  %v893_v45 = vpop.permute.xlu0 %892 }
 0x6f6   :  { %v896_v52 = vadd.f32 %v893_v45, %v889_v49  ;;  %v895_v58 = vadd.f32 %v893_v45, %v888_v55 }
 0x6f7   :  { %2802 = vrsqrt.f32 %v1875_v4  ;;  %vm1884_vm3 = vcmp.eq.f32.partialorder %v1875_v4, inf  ;;  %v1887_v14 = vand.u32 2147483648, %v1875_v4  ;;  %vm1886_vm4 = vcmp.eq.f32.partialorder %v1875_v4, 0.0 }
 0x6fa   :  { %v1870_v5 = vpop.f32.mrf.mxu2 }
 0x6fb   :  { %v1874_v6 = vmul.f32 %v1870_v5, %v1870_v5 }
 0x6fd   :  { %v2803_v7 = vpop.eup %2802  ;;  %v1876_v0 = vadd.f32 1e-16, %v1874_v6 }
 0x6fe   :  { %v1878_v8 = vmul.f32 %v2803_v7, %v1875_v4 }
 0x6ff   :  { %2804 = vrsqrt.f32 %v1876_v0  ;;  %vm1896_vm5 = vcmp.eq.f32.partialorder %v1876_v0, inf  ;;  %v1899_v16 = vand.u32 2147483648, %v1876_v0  ;;  %vm1898_vm6 = vcmp.eq.f32.partialorder %v1876_v0, 0.0 }
 0x700   :  { %v1879_v9 = vmul.f32 %v2803_v7, %v1878_v8 }
 0x702   :  { %v1880_v10 = vmul.f32 0.5, %v1879_v9 }
 0x704   :  { %v1881_v50 = vsub.f32 1.5, %v1880_v10  ;;  %v1951_v10 = vmul.f32 %v3710_v22, %v3706_v62 }
 0x705   :  { %v2805_v57 = vpop.eup %2804 }
 0x706   :  { %v1890_v11 = vmul.f32 %v2805_v57, %v1876_v0  ;;  %v1882_v25 = vmul.f32 %v2803_v7, %v1881_v50 }
 0x708   :  { %v1891_v1 = vmul.f32 %v2805_v57, %v1890_v11  ;;  %v1883_v12 = vmul.f32 %v1882_v25, %v1875_v4 }
 0x70a   :  { %v1885_v17 = vsel %vm1884_vm3, %v1875_v4, %v1883_v12  ;;  %v1892_v18 = vmul.f32 0.5, %v1891_v1  ;;  %v1952_v12 = vmul.f32 %v1948_v32, %v3706_v62 }
 0x70b   :  { %v1888_v19 = vsel %vm1886_vm4, %v1887_v14, %v1885_v17 }
 0x70c   :  { %2806 = vrsqrt.f32 %v1888_v19  ;;  %v1893_v21 = vsub.f32 1.5, %v1892_v18  ;;  %vm1908_vm7 = vcmp.eq.f32.partialorder %v1888_v19, inf  ;;  %v1911_v37 = vand.u32 2147483648, %v1888_v19 }
 0x70d   :  { %vm1910_vm9 = vcmp.eq.f32.partialorder %v1888_v19, 0.0 }
 0x70e   :  { %v1894_v23 = vmul.f32 %v2805_v57, %v1893_v21 }
 0x710   :  { %v1895_v26 = vmul.f32 %v1894_v23, %v1876_v0 }
 0x712   :  { %v2807_v27 = vpop.eup %2806  ;;  %v1897_v28 = vsel %vm1896_vm5, %v1876_v0, %v1895_v26 }
 0x713   :  { %v1902_v15 = vmul.f32 %v2807_v27, %v1888_v19  ;;  %v1900_v29 = vsel %vm1898_vm6, %v1899_v16, %v1897_v28 }
 0x714   :  { %2808 = vrsqrt.f32 %v1900_v29  ;;  %vm1920_vm10 = vcmp.eq.f32.partialorder %v1900_v29, inf  ;;  %v1923_v13 = vand.u32 2147483648, %v1900_v29  ;;  %vm1922_vm11 = vcmp.eq.f32.partialorder %v1900_v29, 0.0 }
 0x715   :  { %v1903_v30 = vmul.f32 %v2807_v27, %v1902_v15  ;;  %2810 = vrcp.f32 %v2823_v59 }
 0x717   :  { %v1904_v31 = vmul.f32 0.5, %v1903_v30 }
 0x719   :  { %v1905_v33 = vsub.f32 1.5, %v1904_v31 }
 0x71a   :  { %v2809_v34 = vpop.eup %2808 }
 0x71b   :  { %v1906_v35 = vmul.f32 %v2807_v27, %v1905_v33  ;;  %v1914_v36 = vmul.f32 %v2809_v34, %v1900_v29  ;;  %v2811_v60 = vpop.eup %2810 }
 0x71c   :  { %v1933_v63 = vmul.f32 8.0, %v2811_v60  ;;  %vm1937_vm12 = vweird.f32 %v2811_v60 }
 0x71d   :  { %v1907_v51 = vmul.f32 %v1906_v35, %v1888_v19  ;;  %v1915_v38 = vmul.f32 %v2809_v34, %v1914_v36 }
 0x71e   :  { %v1934_v3 = vsub.f32 1.0, %v1933_v63 }
 0x71f   :  { %v1909_v39 = vsel %vm1908_vm7, %v1888_v19, %v1907_v51  ;;  %v1916_v41 = vmul.f32 0.5, %v1915_v38 }
 0x720   :  { %v1912_v40 = vsel %vm1910_vm9, %v1911_v37, %v1909_v39  ;;  %v1935_v4 = vmul.f32 %v2811_v60, %v1934_v3 }
 0x721   :  { %v1926_v42 = vsel %vm1925_vm8, %v1912_v40, 0.0  ;;  %v1917_v20 = vsub.f32 1.5, %v1916_v41 }
 0x722   :  { %1927 = vadd.xlane.f32.xlu1 %v1926_v42  ;;  %v1936_v5 = vadd.f32 %v2811_v60, %v1935_v4 }
 0x723   :  { %v1918_v44 = vmul.f32 %v2809_v34, %v1917_v20 }
 0x724   :  { %v1938_v6 = vsel %vm1937_vm12, %v2811_v60, %v1936_v5 }
 0x725   :  { %v1919_v24 = vmul.f32 %v1918_v44, %v1900_v29 }
 0x727   :  { %v1921_v2 = vsel %vm1920_vm10, %v1900_v29, %v1919_v24 }
 0x728   :  { %v1924_v54 = vsel %vm1922_vm11, %v1923_v13, %v1921_v2 }
 0x729   :  { %v1929_v56 = vsel %vm1925_vm8, %v1924_v54, 0.0 }
 0x72a   :  { %1930 = vadd.xlane.f32.xlu2 %v1929_v56 }
 0x73b   :  { %1963 = vrot.lane.b32.xlu1 %v896_v52, %s2819_s1 }
 0x742   :  { %1961 = vrot.lane.b32.xlu2 %v895_v58, %s2819_s1 }
 0x795   :  { %v1928_v7 = vpop.xlane.xlu1 %1927 }
 0x796   :  { %v1939_v0 = vmul.f32 %v1938_v6, %v1928_v7 }
 0x798   :  { %v1941_v8 = vadd.f32 1e-06, %v1939_v0 }
 0x79a   :  { %2812 = vrcp.f32 %v1941_v8 }
 0x79d   :  { %v1931_v9 = vpop.xlane.xlu2 %1930 }
 0x79e   :  { %v1940_v50 = vmul.f32 %v1938_v6, %v1931_v9 }
 0x7a0   :  { %v2813_v57 = vpop.eup %2812  ;;  %v1942_v11 = vadd.f32 1e-06, %v1940_v50 }
 0x7a1   :  { %v1955_v25 = vmul.f32 %v2813_v57, %v1951_v10 }
 0x7a2   :  { %2814 = vrcp.f32 %v1942_v11 }
 0x7a3   :  { %v1957_v1 = vadd.f32 %v1955_v25, %v3160_v46 }
 0x7a5   :  { %1969 = vrot.lane.b32.xlu0 %v1957_v1, %s2820_s21  ;;  %v1962_v19 = vpop.permute.xlu2 %1961 }
 0x7a8   :  { %v2815_v14 = vpop.eup %2814 }
 0x7a9   :  { %v1956_v17 = vmul.f32 %v2815_v14, %v1952_v12 }
 0x7ab   :  { %v1958_v18 = vadd.f32 %v1956_v17, %v3162_v48 }
 0x7ad   :  { %1971 = vrot.lane.b32.xlu0 %v1958_v18, %s2820_s21  ;;  %v1964_v46 = vpop.permute.xlu1 %1963 }
 0x817   :  { %v1970_v21 = vpop.permute.xlu0 %1969 }
 0x818   :  { %v1975_v22 = vsel %vm389_vm2, %v1962_v19, %v1970_v21 }
 0x819   :  { %v1978_v23 = vsel %vm1977_vm13, %v1975_v22, 0.0 }
 0x81a   :  { %1980 = vst [vmem:[%s3753_s16] sm:$0xff] %v1978_v23 }
 0x81f   :  { %v1972_v26 = vpop.permute.xlu0 %1971 }
 0x820   :  { %v1976_v62 = vsel %vm389_vm2, %v1964_v46, %v1972_v26 }
 0x821   :  { %v1979_v27 = vsel %vm1977_vm13, %v1976_v62, 0.0 }
 0x822   :  { %1981 = vst [vmem:[%s3753_s16 + $0x8] sm:$0xff] %v1979_v27 }

</bundles_post_ra>
